<compile_context>
chip_gen: v7x
topology: tpu7x:2x2x1
jax: 0.10.0
libtpu: 0.0.40
codegen_flags: <defaults>
</compile_context>

<pallas_src>
import functools

import jax
import jax.numpy as jnp
from jax import lax
from jax.experimental import pallas as pl
from jax.experimental.pallas import tpu as pltpu

# ----------------------------- small config -----------------------------
B = 2            # batch
S = 8            # sequence length
H = 32           # backbone hidden size
NH = 2           # attention heads
DH = H // NH     # head dim
F = 4 * H        # FFN intermediate dim
L = 2            # number of transformer layers
V = 64           # vocab size
H2 = H // 2      # head hidden size (backbone_hidden_size // 2)
HEAD_ROWS = 8    # sublane-padded CLS rows per grid program
OUT_LANES = 128  # lane-dense output slab width


# ----------------------------- Pallas kernel -----------------------------
def _layer_norm(x, g, b, eps=1e-12):
    mu = jnp.mean(x, axis=-1, keepdims=True)
    var = jnp.mean((x - mu) ** 2, axis=-1, keepdims=True)
    return (x - mu) * lax.rsqrt(var + eps) * g + b


def fused_causal_sent_kernel(gseq, seq_len,
                             ids_ref, seqcol_ref, keyrow_ref,
                             wemb_ref, pos_ref, eg_ref, eb_ref,
                             wqkv_ref, bqkv_ref, wo_ref, bo_ref,
                             ln1g_ref, ln1b_ref, w1_ref, b1_ref,
                             w2_ref, b2_ref, ln2g_ref, ln2b_ref,
                             hw1_ref, hb1_ref, hw2_ref, hb2_ref,
                             out_ref):
    """Embeddings + L encoder layers + CLS-only fused heads for one sequence group."""
    f32 = jnp.float32
    bf16 = jnp.bfloat16
    gtok = gseq * seq_len                       # tokens handled by this grid program

    # ---- embeddings: one-hot matmul gather + positional (in-kernel broadcast) + LN ----
    # TODO(synk): ids kept as a narrow VMEM column because the one-hot gather needs them
    #             in vregs; at real vocab size switch to scalar-prefetched DMA row-gather.
    ids = ids_ref[0]                                               # (gtok, 1) int32
    onehot = (lax.broadcasted_iota(jnp.int32, (gtok, V), 1) == ids).astype(bf16)
    x = jnp.dot(onehot, wemb_ref[...], preferred_element_type=f32)  # (gtok, H)
    pos = pos_ref[...]                                             # (S, H)
    x = x + jnp.concatenate([pos] * gseq, axis=0)                  # broadcast per sequence
    x = _layer_norm(x, eg_ref[...], eb_ref[...])

    # ---- additive attention bias built in-kernel from O(N) vectors ----
    # keyrow[j] = seq_id[j] if key kept else -1  -> one compare handles both
    # block-diagonality (no cross-sequence mixing) and the key mask.
    keep = seqcol_ref[0] == keyrow_ref[0]                          # (gtok,1)==(1,gtok)
    bias = jnp.where(keep, 0.0, -1e9).astype(f32)                  # (gtok, gtok)

    dn_qk = (((1,), (1,)), ((), ()))                               # q · kᵀ
    for l in range(L):
        qkv = jnp.dot(x.astype(bf16), wqkv_ref[l],
                      preferred_element_type=f32) + bqkv_ref[l]    # (gtok, 3H)
        q = qkv[:, 0:H]                   # 1/sqrt(DH) already folded into Wq
        k = qkv[:, H:2 * H]
        v = qkv[:, 2 * H:3 * H]

        ctxs = []
        for h in range(NH):               # static unroll over heads
            qh = q[:, h * DH:(h + 1) * DH].astype(bf16)
            kh = k[:, h * DH:(h + 1) * DH].astype(bf16)
            vh = v[:, h * DH:(h + 1) * DH].astype(bf16)
            sc = lax.dot_general(qh, kh, dn_qk, preferred_element_type=f32) + bias
            sc = sc - jnp.max(sc, axis=-1, keepdims=True)
            p = jnp.exp(sc)
            p = p / jnp.sum(p, axis=-1, keepdims=True)             # exact division
            ctxs.append(jnp.dot(p.astype(bf16), vh, preferred_element_type=f32))
        ctx = jnp.concatenate(ctxs, axis=-1)                       # (gtok, H)
        attn = jnp.dot(ctx.astype(bf16), wo_ref[l],
                       preferred_element_type=f32) + bo_ref[l]     # single full-H o-proj
        x = _layer_norm(x + attn, ln1g_ref[l], ln1b_ref[l])

        hdn = jnp.dot(x.astype(bf16), w1_ref[l], preferred_element_type=f32) + b1_ref[l]
        # TODO(synk): HF DistilBERT uses exact (erf) GELU; tanh approximation used here.
        hdn = jax.nn.gelu(hdn)
        ffn = jnp.dot(hdn.astype(bf16), w2_ref[l], preferred_element_type=f32) + b2_ref[l]
        x = _layer_norm(x + ffn, ln2g_ref[l], ln2b_ref[l])

    # ---- CLS-only fused heads (Riesz || Sentiment), lane-dense (8, 128) store ----
    rows = lax.broadcasted_iota(jnp.int32, (HEAD_ROWS, gtok), 0)
    cols = lax.broadcasted_iota(jnp.int32, (HEAD_ROWS, gtok), 1)
    sel = jnp.where((cols == rows * seq_len) & (rows < gseq), 1.0, 0.0).astype(jnp.float32)
    cls = jnp.dot(sel, x, preferred_element_type=f32)              # (8, H) CLS rows
    hid = jnp.dot(cls, hw1_ref[...], preferred_element_type=f32) + hb1_ref[...]
    hid = jnp.maximum(hid, 0.0)
    out = jnp.dot(hid, hw2_ref[...], preferred_element_type=f32) + hb2_ref[...]   # (8,128)
    out_ref[...] = out            # col 0 = riesz, col 1 = sentiment, rest padding


# ----------------------------- pallas_call wrapper -----------------------------
def _full_spec(a):
    nd = a.ndim
    return pl.BlockSpec(a.shape, lambda g, _nd=nd: (0,) * _nd)


def fused_forward(params, ids, mask):
    """ids: (NB, S) int32; mask: (NB, S) float -> (riesz, sentiment), each (NB, 1)."""
    nb, s = ids.shape
    n_groups = 2 if (nb % 2 == 0 and nb >= 2) else 1   # 2 TC-friendly on v7x
    gseq = nb // n_groups
    assert gseq <= HEAD_ROWS, "sequences per group must fit in the padded CLS slab"
    gtok = gseq * s

    ids3 = ids.reshape(n_groups, gtok, 1).astype(jnp.int32)
    seq_id = jnp.repeat(jnp.arange(nb, dtype=jnp.float32), s)          # (NB*S,)
    seqcol = seq_id.reshape(n_groups, gtok, 1)
    mask_row = mask.reshape(n_groups, 1, gtok).astype(jnp.float32)
    keyrow = jnp.where(mask_row > 0.5, seq_id.reshape(n_groups, 1, gtok), -1.0)

    inputs = [ids3, seqcol, keyrow,
              params["word_emb"], params["pos_emb"],
              params["emb_ln_g"], params["emb_ln_b"],
              *params["layer_stack"], *params["heads"]]

    in_specs = ([pl.BlockSpec((1, gtok, 1), lambda g: (g, 0, 0)),
                 pl.BlockSpec((1, gtok, 1), lambda g: (g, 0, 0)),
                 pl.BlockSpec((1, 1, gtok), lambda g: (g, 0, 0))]
                + [_full_spec(a) for a in inputs[3:]])

    # advisory cost estimate
    per_layer = (2 * gtok * H * 3 * H          # qkv
                 + 2 * 2 * gtok * gtok * H     # scores + ctx
                 + 2 * gtok * H * H            # o-proj
                 + 2 * 2 * gtok * H * F)       # ffn
    flops = n_groups * (2 * gtok * V * H + L * per_layer
                        + 2 * HEAD_ROWS * gtok * H
                        + 2 * HEAD_ROWS * H * (2 * H2)
                        + 2 * HEAD_ROWS * (2 * H2) * OUT_LANES)
    transc = n_groups * L * (NH * gtok * gtok + gtok * F)
    bytes_accessed = (sum(int(a.size) * a.dtype.itemsize for a in inputs)
                      + n_groups * HEAD_ROWS * OUT_LANES * 4)

    out = pl.pallas_call(
        functools.partial(fused_causal_sent_kernel, gseq, s),
        out_shape=jax.ShapeDtypeStruct((n_groups * HEAD_ROWS, OUT_LANES), jnp.float32),
        grid=(n_groups,),
        in_specs=in_specs,
        out_specs=pl.BlockSpec((HEAD_ROWS, OUT_LANES), lambda g: (g, 0)),
        compiler_params=pltpu.CompilerParams(
            dimension_semantics=("parallel",),
            vmem_limit_bytes=32 * 1024 * 1024),
        cost_estimate=pl.CostEstimate(flops=int(flops), transcendentals=int(transc),
                                      bytes_accessed=int(bytes_accessed)),
    )(*inputs)

    cls_out = out.reshape(n_groups, HEAD_ROWS, OUT_LANES)[:, :gseq, 0:2].reshape(nb, 2)
    riesz = cls_out[:, 0:1]
    sentiment = cls_out[:, 1:2]
    return riesz, sentiment


# ----------------------------- parameter construction -----------------------------
def xavier_uniform(key, shape):
    fan_in, fan_out = shape[0], shape[1]
    bound = (6.0 / (fan_in + fan_out)) ** 0.5
    return jax.random.uniform(key, shape, jnp.float32, -bound, bound)


def make_params(key):
    keys = iter(jax.random.split(key, 64))
    params = {}

    # backbone embeddings (word + position, then LayerNorm); word table bf16 (MXU operand)
    params["word_emb"] = (0.02 * jax.random.normal(next(keys), (V, H), jnp.float32)
                          ).astype(jnp.bfloat16)
    params["pos_emb"] = 0.02 * jax.random.normal(next(keys), (S, H), jnp.float32)
    params["emb_ln_g"] = jnp.ones((1, H), jnp.float32)
    params["emb_ln_b"] = jnp.zeros((1, H), jnp.float32)

    scale = 1.0 / (DH ** 0.5)       # folded into Wq (and would be folded into bq) below
    wqkv, bqkv, wo, bo, ln1g, ln1b, w1, b1, w2, b2, ln2g, ln2b = ([] for _ in range(12))
    for _ in range(L):
        wq = 0.02 * jax.random.normal(next(keys), (H, H), jnp.float32) * scale
        wk = 0.02 * jax.random.normal(next(keys), (H, H), jnp.float32)
        wv = 0.02 * jax.random.normal(next(keys), (H, H), jnp.float32)
        wqkv.append(jnp.concatenate([wq, wk, wv], axis=1).astype(jnp.bfloat16))  # (H, 3H)
        bqkv.append(jnp.zeros((1, 3 * H), jnp.float32))     # Q-bias zero -> fold is a no-op
        wo.append((0.02 * jax.random.normal(next(keys), (H, H), jnp.float32)
                   ).astype(jnp.bfloat16))
        bo.append(jnp.zeros((1, H), jnp.float32))
        ln1g.append(jnp.ones((1, H), jnp.float32))
        ln1b.append(jnp.zeros((1, H), jnp.float32))
        w1.append((0.02 * jax.random.normal(next(keys), (H, F), jnp.float32)
                   ).astype(jnp.bfloat16))
        b1.append(jnp.zeros((1, F), jnp.float32))
        w2.append((0.02 * jax.random.normal(next(keys), (F, H), jnp.float32)
                   ).astype(jnp.bfloat16))
        b2.append(jnp.zeros((1, H), jnp.float32))
        ln2g.append(jnp.ones((1, H), jnp.float32))
        ln2b.append(jnp.zeros((1, H), jnp.float32))
    params["layer_stack"] = [jnp.stack(t) for t in
                             (wqkv, bqkv, wo, bo, ln1g, ln1b,
                              w1, b1, w2, b2, ln2g, ln2b)]

    # heads: RieszHead fcn and SentimentHead fcn (probs=False), xavier weights, zero bias.
    # Kept in f32; hw2 is padded lane-dense to OUT_LANES columns (col 0 riesz, col 1 sentiment).
    rw1 = xavier_uniform(next(keys), (H, H2))
    rw2 = xavier_uniform(next(keys), (H2, 1))
    sw1 = xavier_uniform(next(keys), (H, H2))
    sw2 = xavier_uniform(next(keys), (H2, 1))
    hw1 = jnp.concatenate([rw1, sw1], axis=1)                            # (H, 2*H2) f32
    hw2 = jnp.zeros((2 * H2, OUT_LANES), jnp.float32)
    hw2 = hw2.at[:H2, 0:1].set(rw2).at[H2:, 1:2].set(sw2)                # block-diagonal
    params["heads"] = [hw1, jnp.zeros((1, 2 * H2), jnp.float32),
                       hw2, jnp.zeros((1, OUT_LANES), jnp.float32)]
    return params


# ----------------------------- model forward -----------------------------
@functools.partial(jax.jit, static_argnums=(7,))
def causal_sent_forward(params,
                        input_ids_real, input_ids_treated, input_ids_control,
                        attention_mask_real, attention_mask_treated,
                        attention_mask_control, training=True):
    if training:
        # batch the three backbone branches into ONE fused kernel call
        ids_all = jnp.concatenate([input_ids_real, input_ids_treated, input_ids_control],
                                  axis=0)                                 # (3B, S)
        mask_all = jnp.concatenate([attention_mask_real, attention_mask_treated,
                                    attention_mask_control], axis=0)      # (3B, S)
        riesz, sent = fused_forward(params, ids_all, mask_all)            # each (3B, 1)
        return (sent[0:B], sent[B:2 * B], sent[2 * B:3 * B],
                riesz[0:B], riesz[B:2 * B], riesz[2 * B:3 * B])
    else:
        _, sent = fused_forward(params, input_ids_real, attention_mask_real)
        return sent


# ----------------------------- main -----------------------------
if __name__ == "__main__":
    key = jax.random.PRNGKey(0)
    k_params, k_r, k_t, k_c = jax.random.split(key, 4)

    params = make_params(k_params)

    input_ids_real = jax.random.randint(k_r, (B, S), 0, V, dtype=jnp.int32)
    input_ids_treated = jax.random.randint(k_t, (B, S), 0, V, dtype=jnp.int32)
    input_ids_control = jax.random.randint(k_c, (B, S), 0, V, dtype=jnp.int32)

    attention_mask_real = jnp.ones((B, S), jnp.float32).at[1, -2:].set(0.0)
    attention_mask_treated = jnp.ones((B, S), jnp.float32)
    attention_mask_control = jnp.ones((B, S), jnp.float32).at[0, -1:].set(0.0)

    outs = causal_sent_forward(params,
                               input_ids_real, input_ids_treated, input_ids_control,
                               attention_mask_real, attention_mask_treated,
                               attention_mask_control, True)
    outs = jax.block_until_ready(outs)

    assert len(outs) == 6
    for o in outs:
        assert o.shape == (B, 1) and o.dtype == jnp.float32
        assert bool(jnp.all(jnp.isfinite(o)))

    print("KERNEL_OK")
</pallas_src>

<mosaic_0001>
module attributes {stable_mosaic.version = 11 : i64} {
  func.func @fused_causal_sent_kernel(%arg0: i32, %arg1: memref<1x24x1xi32, #tpu.memory_space<vmem>>, %arg2: memref<1x24x1xf32, #tpu.memory_space<vmem>>, %arg3: memref<1x1x24xf32, #tpu.memory_space<vmem>>, %arg4: memref<64x32xbf16, #tpu.memory_space<vmem>>, %arg5: memref<8x32xf32, #tpu.memory_space<vmem>>, %arg6: memref<1x32xf32, #tpu.memory_space<vmem>>, %arg7: memref<1x32xf32, #tpu.memory_space<vmem>>, %arg8: memref<2x32x96xbf16, #tpu.memory_space<vmem>>, %arg9: memref<2x1x96xf32, #tpu.memory_space<vmem>>, %arg10: memref<2x32x32xbf16, #tpu.memory_space<vmem>>, %arg11: memref<2x1x32xf32, #tpu.memory_space<vmem>>, %arg12: memref<2x1x32xf32, #tpu.memory_space<vmem>>, %arg13: memref<2x1x32xf32, #tpu.memory_space<vmem>>, %arg14: memref<2x32x128xbf16, #tpu.memory_space<vmem>>, %arg15: memref<2x1x128xf32, #tpu.memory_space<vmem>>, %arg16: memref<2x128x32xbf16, #tpu.memory_space<vmem>>, %arg17: memref<2x1x32xf32, #tpu.memory_space<vmem>>, %arg18: memref<2x1x32xf32, #tpu.memory_space<vmem>>, %arg19: memref<2x1x32xf32, #tpu.memory_space<vmem>>, %arg20: memref<32x32xf32, #tpu.memory_space<vmem>>, %arg21: memref<1x32xf32, #tpu.memory_space<vmem>>, %arg22: memref<32x128xf32, #tpu.memory_space<vmem>>, %arg23: memref<1x128xf32, #tpu.memory_space<vmem>>, %arg24: memref<8x128xf32, #tpu.memory_space<vmem>>) attributes {dimension_semantics = [#tpu.dimension_semantics<parallel>], iteration_bounds = array<i64: 2>, scalar_prefetch = 0 : i64, scratch_operands = 0 : i64, tpu.core_type = #tpu.core_type<tc>, window_params = [{transform_indices = @transform_0, window_bounds = array<i64: 1, 24, 1>}, {transform_indices = @transform_1, window_bounds = array<i64: 1, 24, 1>}, {transform_indices = @transform_2, window_bounds = array<i64: 1, 1, 24>}, {pipeline_mode = #tpu.pipeline_mode<synchronous>, transform_indices = @transform_3, window_bounds = array<i64: 64, 32>}, {pipeline_mode = #tpu.pipeline_mode<synchronous>, transform_indices = @transform_4, window_bounds = array<i64: 8, 32>}, {pipeline_mode = #tpu.pipeline_mode<synchronous>, transform_indices = @transform_5, window_bounds = array<i64: 1, 32>}, {pipeline_mode = #tpu.pipeline_mode<synchronous>, transform_indices = @transform_6, window_bounds = array<i64: 1, 32>}, {pipeline_mode = #tpu.pipeline_mode<synchronous>, transform_indices = @transform_7, window_bounds = array<i64: 2, 32, 96>}, {pipeline_mode = #tpu.pipeline_mode<synchronous>, transform_indices = @transform_8, window_bounds = array<i64: 2, 1, 96>}, {pipeline_mode = #tpu.pipeline_mode<synchronous>, transform_indices = @transform_9, window_bounds = array<i64: 2, 32, 32>}, {pipeline_mode = #tpu.pipeline_mode<synchronous>, transform_indices = @transform_10, window_bounds = array<i64: 2, 1, 32>}, {pipeline_mode = #tpu.pipeline_mode<synchronous>, transform_indices = @transform_11, window_bounds = array<i64: 2, 1, 32>}, {pipeline_mode = #tpu.pipeline_mode<synchronous>, transform_indices = @transform_12, window_bounds = array<i64: 2, 1, 32>}, {pipeline_mode = #tpu.pipeline_mode<synchronous>, transform_indices = @transform_13, window_bounds = array<i64: 2, 32, 128>}, {pipeline_mode = #tpu.pipeline_mode<synchronous>, transform_indices = @transform_14, window_bounds = array<i64: 2, 1, 128>}, {pipeline_mode = #tpu.pipeline_mode<synchronous>, transform_indices = @transform_15, window_bounds = array<i64: 2, 128, 32>}, {pipeline_mode = #tpu.pipeline_mode<synchronous>, transform_indices = @transform_16, window_bounds = array<i64: 2, 1, 32>}, {pipeline_mode = #tpu.pipeline_mode<synchronous>, transform_indices = @transform_17, window_bounds = array<i64: 2, 1, 32>}, {pipeline_mode = #tpu.pipeline_mode<synchronous>, transform_indices = @transform_18, window_bounds = array<i64: 2, 1, 32>}, {pipeline_mode = #tpu.pipeline_mode<synchronous>, transform_indices = @transform_19, window_bounds = array<i64: 32, 32>}, {pipeline_mode = #tpu.pipeline_mode<synchronous>, transform_indices = @transform_20, window_bounds = array<i64: 1, 32>}, {pipeline_mode = #tpu.pipeline_mode<synchronous>, transform_indices = @transform_21, window_bounds = array<i64: 32, 128>}, {pipeline_mode = #tpu.pipeline_mode<synchronous>, transform_indices = @transform_22, window_bounds = array<i64: 1, 128>}, {transform_indices = @transform_23, window_bounds = array<i64: 8, 128>}]} {
    %c0 = arith.constant 0 : index
    %c0_0 = arith.constant 0 : index
    %c0_1 = arith.constant 0 : index
    %0 = vector.load %arg1[%c0, %c0_0, %c0_1] : memref<1x24x1xi32, #tpu.memory_space<vmem>>, vector<1x24x1xi32>
    %1 = vector.shape_cast %0 : vector<1x24x1xi32> to vector<24x1xi32>
    %2 = tpu.iota {dimensions = array<i32: 1>} : vector<24x64xi32>
    %3 = vector.broadcast %1 : vector<24x1xi32> to vector<24x64xi32>
    %4 = arith.cmpi eq, %2, %3 : vector<24x64xi32>
    %5 = arith.extui %4 : vector<24x64xi1> to vector<24x64xi32>
    %6 = arith.sitofp %5 : vector<24x64xi32> to vector<24x64xf32>
    %7 = arith.truncf %6 : vector<24x64xf32> to vector<24x64xbf16>
    %c0_2 = arith.constant 0 : index
    %c0_3 = arith.constant 0 : index
    %8 = vector.load %arg4[%c0_2, %c0_3] : memref<64x32xbf16, #tpu.memory_space<vmem>>, vector<64x32xbf16>
    %cst = arith.constant dense<0.000000e+00> : vector<24x32xf32>
    %9 = tpu.matmul %7, %8, %cst {dimension_numbers = #tpu.dot_dimension_numbers<[1], [0], [0], [1], [0, 0, 1, 1], [], []>} : vector<24x64xbf16>, vector<64x32xbf16>, vector<24x32xf32> -> vector<24x32xf32>
    %c0_4 = arith.constant 0 : index
    %c0_5 = arith.constant 0 : index
    %10 = vector.load %arg5[%c0_4, %c0_5] : memref<8x32xf32, #tpu.memory_space<vmem>>, vector<8x32xf32>
    %11 = tpu.concatenate %10, %10, %10 in 0 : vector<8x32xf32>, vector<8x32xf32>, vector<8x32xf32> -> vector<24x32xf32>
    %12 = arith.addf %9, %11 : vector<24x32xf32>
    %c0_6 = arith.constant 0 : index
    %c0_7 = arith.constant 0 : index
    %13 = vector.load %arg6[%c0_6, %c0_7] : memref<1x32xf32, #tpu.memory_space<vmem>>, vector<1x32xf32>
    %c0_8 = arith.constant 0 : index
    %c0_9 = arith.constant 0 : index
    %14 = vector.load %arg7[%c0_8, %c0_9] : memref<1x32xf32, #tpu.memory_space<vmem>>, vector<1x32xf32>
    %cst_10 = arith.constant dense<0.000000e+00> : vector<24xf32>
    %15 = vector.multi_reduction <add>, %12, %cst_10 [1] : vector<24x32xf32> to vector<24xf32>
    %16 = vector.shape_cast %15 : vector<24xf32> to vector<24x1xf32>
    %cst_11 = arith.constant 3.200000e+01 : f32
    %17 = vector.broadcast %cst_11 : f32 to vector<24x1xf32>
    %18 = arith.divf %16, %17 : vector<24x1xf32>
    %19 = vector.broadcast %18 : vector<24x1xf32> to vector<24x32xf32>
    %20 = arith.subf %12, %19 : vector<24x32xf32>
    %21 = arith.mulf %20, %20 : vector<24x32xf32>
    %cst_12 = arith.constant dense<0.000000e+00> : vector<24xf32>
    %22 = vector.multi_reduction <add>, %21, %cst_12 [1] : vector<24x32xf32> to vector<24xf32>
    %23 = vector.shape_cast %22 : vector<24xf32> to vector<24x1xf32>
    %cst_13 = arith.constant 3.200000e+01 : f32
    %24 = vector.broadcast %cst_13 : f32 to vector<24x1xf32>
    %25 = arith.divf %23, %24 : vector<24x1xf32>
    %26 = vector.broadcast %18 : vector<24x1xf32> to vector<24x32xf32>
    %27 = arith.subf %12, %26 : vector<24x32xf32>
    %cst_14 = arith.constant 9.99999996E-13 : f32
    %28 = vector.broadcast %cst_14 : f32 to vector<24x1xf32>
    %29 = arith.addf %25, %28 : vector<24x1xf32>
    %30 = math.rsqrt %29 : vector<24x1xf32>
    %31 = vector.broadcast %30 : vector<24x1xf32> to vector<24x32xf32>
    %32 = arith.mulf %27, %31 : vector<24x32xf32>
    %33 = vector.broadcast %13 : vector<1x32xf32> to vector<24x32xf32>
    %34 = arith.mulf %32, %33 : vector<24x32xf32>
    %35 = vector.broadcast %14 : vector<1x32xf32> to vector<24x32xf32>
    %36 = arith.addf %34, %35 : vector<24x32xf32>
    %c0_15 = arith.constant 0 : index
    %c0_16 = arith.constant 0 : index
    %c0_17 = arith.constant 0 : index
    %37 = vector.load %arg2[%c0_15, %c0_16, %c0_17] : memref<1x24x1xf32, #tpu.memory_space<vmem>>, vector<1x24x1xf32>
    %38 = vector.shape_cast %37 : vector<1x24x1xf32> to vector<24x1xf32>
    %c0_18 = arith.constant 0 : index
    %c0_19 = arith.constant 0 : index
    %c0_20 = arith.constant 0 : index
    %39 = vector.load %arg3[%c0_18, %c0_19, %c0_20] : memref<1x1x24xf32, #tpu.memory_space<vmem>>, vector<1x1x24xf32>
    %40 = vector.shape_cast %39 : vector<1x1x24xf32> to vector<1x24xf32>
    %41 = vector.broadcast %38 : vector<24x1xf32> to vector<24x24xf32>
    %42 = vector.broadcast %40 : vector<1x24xf32> to vector<24x24xf32>
    %43 = arith.cmpf oeq, %41, %42 : vector<24x24xf32>
    %cst_21 = arith.constant 0.000000e+00 : f32
    %cst_22 = arith.constant -1.000000e+09 : f32
    %44 = vector.broadcast %cst_21 : f32 to vector<24x24xf32>
    %45 = vector.broadcast %cst_22 : f32 to vector<24x24xf32>
    %46 = arith.select %43, %44, %45 : vector<24x24xi1>, vector<24x24xf32>
    %47 = arith.truncf %36 : vector<24x32xf32> to vector<24x32xbf16>
    %c0_23 = arith.constant 0 : index
    %c0_24 = arith.constant 0 : index
    %c0_25 = arith.constant 0 : index
    %48 = vector.load %arg8[%c0_23, %c0_24, %c0_25] : memref<2x32x96xbf16, #tpu.memory_space<vmem>>, vector<1x32x96xbf16>
    %49 = vector.shape_cast %48 : vector<1x32x96xbf16> to vector<32x96xbf16>
    %cst_26 = arith.constant dense<0.000000e+00> : vector<24x96xf32>
    %50 = tpu.matmul %47, %49, %cst_26 {dimension_numbers = #tpu.dot_dimension_numbers<[1], [0], [0], [1], [0, 0, 1, 1], [], []>} : vector<24x32xbf16>, vector<32x96xbf16>, vector<24x96xf32> -> vector<24x96xf32>
    %c0_27 = arith.constant 0 : index
    %c0_28 = arith.constant 0 : index
    %c0_29 = arith.constant 0 : index
    %51 = vector.load %arg9[%c0_27, %c0_28, %c0_29] : memref<2x1x96xf32, #tpu.memory_space<vmem>>, vector<1x1x96xf32>
    %52 = vector.shape_cast %51 : vector<1x1x96xf32> to vector<1x96xf32>
    %53 = vector.broadcast %52 : vector<1x96xf32> to vector<24x96xf32>
    %54 = arith.addf %50, %53 : vector<24x96xf32>
    %55 = vector.extract_strided_slice %54 {offsets = [0, 0], sizes = [24, 32], strides = [1, 1]} : vector<24x96xf32> to vector<24x32xf32>
    %56 = vector.extract_strided_slice %54 {offsets = [0, 32], sizes = [24, 32], strides = [1, 1]} : vector<24x96xf32> to vector<24x32xf32>
    %57 = vector.extract_strided_slice %54 {offsets = [0, 64], sizes = [24, 32], strides = [1, 1]} : vector<24x96xf32> to vector<24x32xf32>
    %58 = vector.extract_strided_slice %55 {offsets = [0, 0], sizes = [24, 16], strides = [1, 1]} : vector<24x32xf32> to vector<24x16xf32>
    %59 = arith.truncf %58 : vector<24x16xf32> to vector<24x16xbf16>
    %60 = vector.extract_strided_slice %56 {offsets = [0, 0], sizes = [24, 16], strides = [1, 1]} : vector<24x32xf32> to vector<24x16xf32>
    %61 = arith.truncf %60 : vector<24x16xf32> to vector<24x16xbf16>
    %62 = vector.extract_strided_slice %57 {offsets = [0, 0], sizes = [24, 16], strides = [1, 1]} : vector<24x32xf32> to vector<24x16xf32>
    %63 = arith.truncf %62 : vector<24x16xf32> to vector<24x16xbf16>
    %cst_30 = arith.constant dense<0.000000e+00> : vector<24x24xf32>
    %64 = tpu.matmul %59, %61, %cst_30 {dimension_numbers = #tpu.dot_dimension_numbers<[1], [1], [0], [0], [0, 0, 1, 0], [], []>} : vector<24x16xbf16>, vector<24x16xbf16>, vector<24x24xf32> -> vector<24x24xf32>
    %65 = arith.addf %64, %46 : vector<24x24xf32>
    %cst_31 = arith.constant dense<0xFF800000> : vector<24xf32>
    %66 = vector.multi_reduction <maximumf>, %65, %cst_31 [1] : vector<24x24xf32> to vector<24xf32>
    %67 = vector.shape_cast %66 : vector<24xf32> to vector<24x1xf32>
    %68 = vector.broadcast %67 : vector<24x1xf32> to vector<24x24xf32>
    %69 = arith.subf %65, %68 : vector<24x24xf32>
    %70 = math.exp %69 : vector<24x24xf32>
    %cst_32 = arith.constant dense<0.000000e+00> : vector<24xf32>
    %71 = vector.multi_reduction <add>, %70, %cst_32 [1] : vector<24x24xf32> to vector<24xf32>
    %72 = vector.shape_cast %71 : vector<24xf32> to vector<24x1xf32>
    %73 = vector.broadcast %72 : vector<24x1xf32> to vector<24x24xf32>
    %74 = arith.divf %70, %73 : vector<24x24xf32>
    %75 = arith.truncf %74 : vector<24x24xf32> to vector<24x24xbf16>
    %cst_33 = arith.constant dense<0.000000e+00> : vector<24x16xf32>
    %76 = tpu.matmul %75, %63, %cst_33 {dimension_numbers = #tpu.dot_dimension_numbers<[1], [0], [0], [1], [0, 0, 1, 1], [], []>} : vector<24x24xbf16>, vector<24x16xbf16>, vector<24x16xf32> -> vector<24x16xf32>
    %77 = vector.extract_strided_slice %55 {offsets = [0, 16], sizes = [24, 16], strides = [1, 1]} : vector<24x32xf32> to vector<24x16xf32>
    %78 = arith.truncf %77 : vector<24x16xf32> to vector<24x16xbf16>
    %79 = vector.extract_strided_slice %56 {offsets = [0, 16], sizes = [24, 16], strides = [1, 1]} : vector<24x32xf32> to vector<24x16xf32>
    %80 = arith.truncf %79 : vector<24x16xf32> to vector<24x16xbf16>
    %81 = vector.extract_strided_slice %57 {offsets = [0, 16], sizes = [24, 16], strides = [1, 1]} : vector<24x32xf32> to vector<24x16xf32>
    %82 = arith.truncf %81 : vector<24x16xf32> to vector<24x16xbf16>
    %cst_34 = arith.constant dense<0.000000e+00> : vector<24x24xf32>
    %83 = tpu.matmul %78, %80, %cst_34 {dimension_numbers = #tpu.dot_dimension_numbers<[1], [1], [0], [0], [0, 0, 1, 0], [], []>} : vector<24x16xbf16>, vector<24x16xbf16>, vector<24x24xf32> -> vector<24x24xf32>
    %84 = arith.addf %83, %46 : vector<24x24xf32>
    %cst_35 = arith.constant dense<0xFF800000> : vector<24xf32>
    %85 = vector.multi_reduction <maximumf>, %84, %cst_35 [1] : vector<24x24xf32> to vector<24xf32>
    %86 = vector.shape_cast %85 : vector<24xf32> to vector<24x1xf32>
    %87 = vector.broadcast %86 : vector<24x1xf32> to vector<24x24xf32>
    %88 = arith.subf %84, %87 : vector<24x24xf32>
    %89 = math.exp %88 : vector<24x24xf32>
    %cst_36 = arith.constant dense<0.000000e+00> : vector<24xf32>
    %90 = vector.multi_reduction <add>, %89, %cst_36 [1] : vector<24x24xf32> to vector<24xf32>
    %91 = vector.shape_cast %90 : vector<24xf32> to vector<24x1xf32>
    %92 = vector.broadcast %91 : vector<24x1xf32> to vector<24x24xf32>
    %93 = arith.divf %89, %92 : vector<24x24xf32>
    %94 = arith.truncf %93 : vector<24x24xf32> to vector<24x24xbf16>
    %cst_37 = arith.constant dense<0.000000e+00> : vector<24x16xf32>
    %95 = tpu.matmul %94, %82, %cst_37 {dimension_numbers = #tpu.dot_dimension_numbers<[1], [0], [0], [1], [0, 0, 1, 1], [], []>} : vector<24x24xbf16>, vector<24x16xbf16>, vector<24x16xf32> -> vector<24x16xf32>
    %96 = tpu.concatenate %76, %95 in 1 : vector<24x16xf32>, vector<24x16xf32> -> vector<24x32xf32>
    %97 = arith.truncf %96 : vector<24x32xf32> to vector<24x32xbf16>
    %c0_38 = arith.constant 0 : index
    %c0_39 = arith.constant 0 : index
    %c0_40 = arith.constant 0 : index
    %98 = vector.load %arg10[%c0_38, %c0_39, %c0_40] : memref<2x32x32xbf16, #tpu.memory_space<vmem>>, vector<1x32x32xbf16>
    %99 = vector.shape_cast %98 : vector<1x32x32xbf16> to vector<32x32xbf16>
    %cst_41 = arith.constant dense<0.000000e+00> : vector<24x32xf32>
    %100 = tpu.matmul %97, %99, %cst_41 {dimension_numbers = #tpu.dot_dimension_numbers<[1], [0], [0], [1], [0, 0, 1, 1], [], []>} : vector<24x32xbf16>, vector<32x32xbf16>, vector<24x32xf32> -> vector<24x32xf32>
    %c0_42 = arith.constant 0 : index
    %c0_43 = arith.constant 0 : index
    %c0_44 = arith.constant 0 : index
    %101 = vector.load %arg11[%c0_42, %c0_43, %c0_44] : memref<2x1x32xf32, #tpu.memory_space<vmem>>, vector<1x1x32xf32>
    %102 = vector.shape_cast %101 : vector<1x1x32xf32> to vector<1x32xf32>
    %103 = vector.broadcast %102 : vector<1x32xf32> to vector<24x32xf32>
    %104 = arith.addf %100, %103 : vector<24x32xf32>
    %105 = arith.addf %36, %104 : vector<24x32xf32>
    %c0_45 = arith.constant 0 : index
    %c0_46 = arith.constant 0 : index
    %c0_47 = arith.constant 0 : index
    %106 = vector.load %arg12[%c0_45, %c0_46, %c0_47] : memref<2x1x32xf32, #tpu.memory_space<vmem>>, vector<1x1x32xf32>
    %107 = vector.shape_cast %106 : vector<1x1x32xf32> to vector<1x32xf32>
    %c0_48 = arith.constant 0 : index
    %c0_49 = arith.constant 0 : index
    %c0_50 = arith.constant 0 : index
    %108 = vector.load %arg13[%c0_48, %c0_49, %c0_50] : memref<2x1x32xf32, #tpu.memory_space<vmem>>, vector<1x1x32xf32>
    %109 = vector.shape_cast %108 : vector<1x1x32xf32> to vector<1x32xf32>
    %cst_51 = arith.constant dense<0.000000e+00> : vector<24xf32>
    %110 = vector.multi_reduction <add>, %105, %cst_51 [1] : vector<24x32xf32> to vector<24xf32>
    %111 = vector.shape_cast %110 : vector<24xf32> to vector<24x1xf32>
    %cst_52 = arith.constant 3.200000e+01 : f32
    %112 = vector.broadcast %cst_52 : f32 to vector<24x1xf32>
    %113 = arith.divf %111, %112 : vector<24x1xf32>
    %114 = vector.broadcast %113 : vector<24x1xf32> to vector<24x32xf32>
    %115 = arith.subf %105, %114 : vector<24x32xf32>
    %116 = arith.mulf %115, %115 : vector<24x32xf32>
    %cst_53 = arith.constant dense<0.000000e+00> : vector<24xf32>
    %117 = vector.multi_reduction <add>, %116, %cst_53 [1] : vector<24x32xf32> to vector<24xf32>
    %118 = vector.shape_cast %117 : vector<24xf32> to vector<24x1xf32>
    %cst_54 = arith.constant 3.200000e+01 : f32
    %119 = vector.broadcast %cst_54 : f32 to vector<24x1xf32>
    %120 = arith.divf %118, %119 : vector<24x1xf32>
    %121 = vector.broadcast %113 : vector<24x1xf32> to vector<24x32xf32>
    %122 = arith.subf %105, %121 : vector<24x32xf32>
    %cst_55 = arith.constant 9.99999996E-13 : f32
    %123 = vector.broadcast %cst_55 : f32 to vector<24x1xf32>
    %124 = arith.addf %120, %123 : vector<24x1xf32>
    %125 = math.rsqrt %124 : vector<24x1xf32>
    %126 = vector.broadcast %125 : vector<24x1xf32> to vector<24x32xf32>
    %127 = arith.mulf %122, %126 : vector<24x32xf32>
    %128 = vector.broadcast %107 : vector<1x32xf32> to vector<24x32xf32>
    %129 = arith.mulf %127, %128 : vector<24x32xf32>
    %130 = vector.broadcast %109 : vector<1x32xf32> to vector<24x32xf32>
    %131 = arith.addf %129, %130 : vector<24x32xf32>
    %132 = arith.truncf %131 : vector<24x32xf32> to vector<24x32xbf16>
    %c0_56 = arith.constant 0 : index
    %c0_57 = arith.constant 0 : index
    %c0_58 = arith.constant 0 : index
    %133 = vector.load %arg14[%c0_56, %c0_57, %c0_58] : memref<2x32x128xbf16, #tpu.memory_space<vmem>>, vector<1x32x128xbf16>
    %134 = vector.shape_cast %133 : vector<1x32x128xbf16> to vector<32x128xbf16>
    %cst_59 = arith.constant dense<0.000000e+00> : vector<24x128xf32>
    %135 = tpu.matmul %132, %134, %cst_59 {dimension_numbers = #tpu.dot_dimension_numbers<[1], [0], [0], [1], [0, 0, 1, 1], [], []>} : vector<24x32xbf16>, vector<32x128xbf16>, vector<24x128xf32> -> vector<24x128xf32>
    %c0_60 = arith.constant 0 : index
    %c0_61 = arith.constant 0 : index
    %c0_62 = arith.constant 0 : index
    %136 = vector.load %arg15[%c0_60, %c0_61, %c0_62] : memref<2x1x128xf32, #tpu.memory_space<vmem>>, vector<1x1x128xf32>
    %137 = vector.shape_cast %136 : vector<1x1x128xf32> to vector<1x128xf32>
    %138 = vector.broadcast %137 : vector<1x128xf32> to vector<24x128xf32>
    %139 = arith.addf %135, %138 : vector<24x128xf32>
    %140 = arith.mulf %139, %139 : vector<24x128xf32>
    %141 = arith.mulf %139, %140 : vector<24x128xf32>
    %cst_63 = arith.constant 4.471500e-02 : f32
    %142 = vector.broadcast %cst_63 : f32 to vector<24x128xf32>
    %143 = arith.mulf %142, %141 : vector<24x128xf32>
    %144 = arith.addf %139, %143 : vector<24x128xf32>
    %cst_64 = arith.constant 0.797884583 : f32
    %145 = vector.broadcast %cst_64 : f32 to vector<24x128xf32>
    %146 = arith.mulf %145, %144 : vector<24x128xf32>
    %147 = math.tanh %146 : vector<24x128xf32>
    %cst_65 = arith.constant 1.000000e+00 : f32
    %148 = vector.broadcast %cst_65 : f32 to vector<24x128xf32>
    %149 = arith.addf %148, %147 : vector<24x128xf32>
    %cst_66 = arith.constant 5.000000e-01 : f32
    %150 = vector.broadcast %cst_66 : f32 to vector<24x128xf32>
    %151 = arith.mulf %150, %149 : vector<24x128xf32>
    %152 = arith.mulf %139, %151 : vector<24x128xf32>
    %153 = arith.truncf %152 : vector<24x128xf32> to vector<24x128xbf16>
    %c0_67 = arith.constant 0 : index
    %c0_68 = arith.constant 0 : index
    %c0_69 = arith.constant 0 : index
    %154 = vector.load %arg16[%c0_67, %c0_68, %c0_69] : memref<2x128x32xbf16, #tpu.memory_space<vmem>>, vector<1x128x32xbf16>
    %155 = vector.shape_cast %154 : vector<1x128x32xbf16> to vector<128x32xbf16>
    %cst_70 = arith.constant dense<0.000000e+00> : vector<24x32xf32>
    %156 = tpu.matmul %153, %155, %cst_70 {dimension_numbers = #tpu.dot_dimension_numbers<[1], [0], [0], [1], [0, 0, 1, 1], [], []>} : vector<24x128xbf16>, vector<128x32xbf16>, vector<24x32xf32> -> vector<24x32xf32>
    %c0_71 = arith.constant 0 : index
    %c0_72 = arith.constant 0 : index
    %c0_73 = arith.constant 0 : index
    %157 = vector.load %arg17[%c0_71, %c0_72, %c0_73] : memref<2x1x32xf32, #tpu.memory_space<vmem>>, vector<1x1x32xf32>
    %158 = vector.shape_cast %157 : vector<1x1x32xf32> to vector<1x32xf32>
    %159 = vector.broadcast %158 : vector<1x32xf32> to vector<24x32xf32>
    %160 = arith.addf %156, %159 : vector<24x32xf32>
    %161 = arith.addf %131, %160 : vector<24x32xf32>
    %c0_74 = arith.constant 0 : index
    %c0_75 = arith.constant 0 : index
    %c0_76 = arith.constant 0 : index
    %162 = vector.load %arg18[%c0_74, %c0_75, %c0_76] : memref<2x1x32xf32, #tpu.memory_space<vmem>>, vector<1x1x32xf32>
    %163 = vector.shape_cast %162 : vector<1x1x32xf32> to vector<1x32xf32>
    %c0_77 = arith.constant 0 : index
    %c0_78 = arith.constant 0 : index
    %c0_79 = arith.constant 0 : index
    %164 = vector.load %arg19[%c0_77, %c0_78, %c0_79] : memref<2x1x32xf32, #tpu.memory_space<vmem>>, vector<1x1x32xf32>
    %165 = vector.shape_cast %164 : vector<1x1x32xf32> to vector<1x32xf32>
    %cst_80 = arith.constant dense<0.000000e+00> : vector<24xf32>
    %166 = vector.multi_reduction <add>, %161, %cst_80 [1] : vector<24x32xf32> to vector<24xf32>
    %167 = vector.shape_cast %166 : vector<24xf32> to vector<24x1xf32>
    %cst_81 = arith.constant 3.200000e+01 : f32
    %168 = vector.broadcast %cst_81 : f32 to vector<24x1xf32>
    %169 = arith.divf %167, %168 : vector<24x1xf32>
    %170 = vector.broadcast %169 : vector<24x1xf32> to vector<24x32xf32>
    %171 = arith.subf %161, %170 : vector<24x32xf32>
    %172 = arith.mulf %171, %171 : vector<24x32xf32>
    %cst_82 = arith.constant dense<0.000000e+00> : vector<24xf32>
    %173 = vector.multi_reduction <add>, %172, %cst_82 [1] : vector<24x32xf32> to vector<24xf32>
    %174 = vector.shape_cast %173 : vector<24xf32> to vector<24x1xf32>
    %cst_83 = arith.constant 3.200000e+01 : f32
    %175 = vector.broadcast %cst_83 : f32 to vector<24x1xf32>
    %176 = arith.divf %174, %175 : vector<24x1xf32>
    %177 = vector.broadcast %169 : vector<24x1xf32> to vector<24x32xf32>
    %178 = arith.subf %161, %177 : vector<24x32xf32>
    %cst_84 = arith.constant 9.99999996E-13 : f32
    %179 = vector.broadcast %cst_84 : f32 to vector<24x1xf32>
    %180 = arith.addf %176, %179 : vector<24x1xf32>
    %181 = math.rsqrt %180 : vector<24x1xf32>
    %182 = vector.broadcast %181 : vector<24x1xf32> to vector<24x32xf32>
    %183 = arith.mulf %178, %182 : vector<24x32xf32>
    %184 = vector.broadcast %163 : vector<1x32xf32> to vector<24x32xf32>
    %185 = arith.mulf %183, %184 : vector<24x32xf32>
    %186 = vector.broadcast %165 : vector<1x32xf32> to vector<24x32xf32>
    %187 = arith.addf %185, %186 : vector<24x32xf32>
    %188 = arith.truncf %187 : vector<24x32xf32> to vector<24x32xbf16>
    %c1 = arith.constant 1 : index
    %c0_85 = arith.constant 0 : index
    %c0_86 = arith.constant 0 : index
    %189 = vector.load %arg8[%c1, %c0_85, %c0_86] : memref<2x32x96xbf16, #tpu.memory_space<vmem>>, vector<1x32x96xbf16>
    %190 = vector.shape_cast %189 : vector<1x32x96xbf16> to vector<32x96xbf16>
    %cst_87 = arith.constant dense<0.000000e+00> : vector<24x96xf32>
    %191 = tpu.matmul %188, %190, %cst_87 {dimension_numbers = #tpu.dot_dimension_numbers<[1], [0], [0], [1], [0, 0, 1, 1], [], []>} : vector<24x32xbf16>, vector<32x96xbf16>, vector<24x96xf32> -> vector<24x96xf32>
    %c1_88 = arith.constant 1 : index
    %c0_89 = arith.constant 0 : index
    %c0_90 = arith.constant 0 : index
    %192 = vector.load %arg9[%c1_88, %c0_89, %c0_90] : memref<2x1x96xf32, #tpu.memory_space<vmem>>, vector<1x1x96xf32>
    %193 = vector.shape_cast %192 : vector<1x1x96xf32> to vector<1x96xf32>
    %194 = vector.broadcast %193 : vector<1x96xf32> to vector<24x96xf32>
    %195 = arith.addf %191, %194 : vector<24x96xf32>
    %196 = vector.extract_strided_slice %195 {offsets = [0, 0], sizes = [24, 32], strides = [1, 1]} : vector<24x96xf32> to vector<24x32xf32>
    %197 = vector.extract_strided_slice %195 {offsets = [0, 32], sizes = [24, 32], strides = [1, 1]} : vector<24x96xf32> to vector<24x32xf32>
    %198 = vector.extract_strided_slice %195 {offsets = [0, 64], sizes = [24, 32], strides = [1, 1]} : vector<24x96xf32> to vector<24x32xf32>
    %199 = vector.extract_strided_slice %196 {offsets = [0, 0], sizes = [24, 16], strides = [1, 1]} : vector<24x32xf32> to vector<24x16xf32>
    %200 = arith.truncf %199 : vector<24x16xf32> to vector<24x16xbf16>
    %201 = vector.extract_strided_slice %197 {offsets = [0, 0], sizes = [24, 16], strides = [1, 1]} : vector<24x32xf32> to vector<24x16xf32>
    %202 = arith.truncf %201 : vector<24x16xf32> to vector<24x16xbf16>
    %203 = vector.extract_strided_slice %198 {offsets = [0, 0], sizes = [24, 16], strides = [1, 1]} : vector<24x32xf32> to vector<24x16xf32>
    %204 = arith.truncf %203 : vector<24x16xf32> to vector<24x16xbf16>
    %cst_91 = arith.constant dense<0.000000e+00> : vector<24x24xf32>
    %205 = tpu.matmul %200, %202, %cst_91 {dimension_numbers = #tpu.dot_dimension_numbers<[1], [1], [0], [0], [0, 0, 1, 0], [], []>} : vector<24x16xbf16>, vector<24x16xbf16>, vector<24x24xf32> -> vector<24x24xf32>
    %206 = arith.addf %205, %46 : vector<24x24xf32>
    %cst_92 = arith.constant dense<0xFF800000> : vector<24xf32>
    %207 = vector.multi_reduction <maximumf>, %206, %cst_92 [1] : vector<24x24xf32> to vector<24xf32>
    %208 = vector.shape_cast %207 : vector<24xf32> to vector<24x1xf32>
    %209 = vector.broadcast %208 : vector<24x1xf32> to vector<24x24xf32>
    %210 = arith.subf %206, %209 : vector<24x24xf32>
    %211 = math.exp %210 : vector<24x24xf32>
    %cst_93 = arith.constant dense<0.000000e+00> : vector<24xf32>
    %212 = vector.multi_reduction <add>, %211, %cst_93 [1] : vector<24x24xf32> to vector<24xf32>
    %213 = vector.shape_cast %212 : vector<24xf32> to vector<24x1xf32>
    %214 = vector.broadcast %213 : vector<24x1xf32> to vector<24x24xf32>
    %215 = arith.divf %211, %214 : vector<24x24xf32>
    %216 = arith.truncf %215 : vector<24x24xf32> to vector<24x24xbf16>
    %cst_94 = arith.constant dense<0.000000e+00> : vector<24x16xf32>
    %217 = tpu.matmul %216, %204, %cst_94 {dimension_numbers = #tpu.dot_dimension_numbers<[1], [0], [0], [1], [0, 0, 1, 1], [], []>} : vector<24x24xbf16>, vector<24x16xbf16>, vector<24x16xf32> -> vector<24x16xf32>
    %218 = vector.extract_strided_slice %196 {offsets = [0, 16], sizes = [24, 16], strides = [1, 1]} : vector<24x32xf32> to vector<24x16xf32>
    %219 = arith.truncf %218 : vector<24x16xf32> to vector<24x16xbf16>
    %220 = vector.extract_strided_slice %197 {offsets = [0, 16], sizes = [24, 16], strides = [1, 1]} : vector<24x32xf32> to vector<24x16xf32>
    %221 = arith.truncf %220 : vector<24x16xf32> to vector<24x16xbf16>
    %222 = vector.extract_strided_slice %198 {offsets = [0, 16], sizes = [24, 16], strides = [1, 1]} : vector<24x32xf32> to vector<24x16xf32>
    %223 = arith.truncf %222 : vector<24x16xf32> to vector<24x16xbf16>
    %cst_95 = arith.constant dense<0.000000e+00> : vector<24x24xf32>
    %224 = tpu.matmul %219, %221, %cst_95 {dimension_numbers = #tpu.dot_dimension_numbers<[1], [1], [0], [0], [0, 0, 1, 0], [], []>} : vector<24x16xbf16>, vector<24x16xbf16>, vector<24x24xf32> -> vector<24x24xf32>
    %225 = arith.addf %224, %46 : vector<24x24xf32>
    %cst_96 = arith.constant dense<0xFF800000> : vector<24xf32>
    %226 = vector.multi_reduction <maximumf>, %225, %cst_96 [1] : vector<24x24xf32> to vector<24xf32>
    %227 = vector.shape_cast %226 : vector<24xf32> to vector<24x1xf32>
    %228 = vector.broadcast %227 : vector<24x1xf32> to vector<24x24xf32>
    %229 = arith.subf %225, %228 : vector<24x24xf32>
    %230 = math.exp %229 : vector<24x24xf32>
    %cst_97 = arith.constant dense<0.000000e+00> : vector<24xf32>
    %231 = vector.multi_reduction <add>, %230, %cst_97 [1] : vector<24x24xf32> to vector<24xf32>
    %232 = vector.shape_cast %231 : vector<24xf32> to vector<24x1xf32>
    %233 = vector.broadcast %232 : vector<24x1xf32> to vector<24x24xf32>
    %234 = arith.divf %230, %233 : vector<24x24xf32>
    %235 = arith.truncf %234 : vector<24x24xf32> to vector<24x24xbf16>
    %cst_98 = arith.constant dense<0.000000e+00> : vector<24x16xf32>
    %236 = tpu.matmul %235, %223, %cst_98 {dimension_numbers = #tpu.dot_dimension_numbers<[1], [0], [0], [1], [0, 0, 1, 1], [], []>} : vector<24x24xbf16>, vector<24x16xbf16>, vector<24x16xf32> -> vector<24x16xf32>
    %237 = tpu.concatenate %217, %236 in 1 : vector<24x16xf32>, vector<24x16xf32> -> vector<24x32xf32>
    %238 = arith.truncf %237 : vector<24x32xf32> to vector<24x32xbf16>
    %c1_99 = arith.constant 1 : index
    %c0_100 = arith.constant 0 : index
    %c0_101 = arith.constant 0 : index
    %239 = vector.load %arg10[%c1_99, %c0_100, %c0_101] : memref<2x32x32xbf16, #tpu.memory_space<vmem>>, vector<1x32x32xbf16>
    %240 = vector.shape_cast %239 : vector<1x32x32xbf16> to vector<32x32xbf16>
    %cst_102 = arith.constant dense<0.000000e+00> : vector<24x32xf32>
    %241 = tpu.matmul %238, %240, %cst_102 {dimension_numbers = #tpu.dot_dimension_numbers<[1], [0], [0], [1], [0, 0, 1, 1], [], []>} : vector<24x32xbf16>, vector<32x32xbf16>, vector<24x32xf32> -> vector<24x32xf32>
    %c1_103 = arith.constant 1 : index
    %c0_104 = arith.constant 0 : index
    %c0_105 = arith.constant 0 : index
    %242 = vector.load %arg11[%c1_103, %c0_104, %c0_105] : memref<2x1x32xf32, #tpu.memory_space<vmem>>, vector<1x1x32xf32>
    %243 = vector.shape_cast %242 : vector<1x1x32xf32> to vector<1x32xf32>
    %244 = vector.broadcast %243 : vector<1x32xf32> to vector<24x32xf32>
    %245 = arith.addf %241, %244 : vector<24x32xf32>
    %246 = arith.addf %187, %245 : vector<24x32xf32>
    %c1_106 = arith.constant 1 : index
    %c0_107 = arith.constant 0 : index
    %c0_108 = arith.constant 0 : index
    %247 = vector.load %arg12[%c1_106, %c0_107, %c0_108] : memref<2x1x32xf32, #tpu.memory_space<vmem>>, vector<1x1x32xf32>
    %248 = vector.shape_cast %247 : vector<1x1x32xf32> to vector<1x32xf32>
    %c1_109 = arith.constant 1 : index
    %c0_110 = arith.constant 0 : index
    %c0_111 = arith.constant 0 : index
    %249 = vector.load %arg13[%c1_109, %c0_110, %c0_111] : memref<2x1x32xf32, #tpu.memory_space<vmem>>, vector<1x1x32xf32>
    %250 = vector.shape_cast %249 : vector<1x1x32xf32> to vector<1x32xf32>
    %cst_112 = arith.constant dense<0.000000e+00> : vector<24xf32>
    %251 = vector.multi_reduction <add>, %246, %cst_112 [1] : vector<24x32xf32> to vector<24xf32>
    %252 = vector.shape_cast %251 : vector<24xf32> to vector<24x1xf32>
    %cst_113 = arith.constant 3.200000e+01 : f32
    %253 = vector.broadcast %cst_113 : f32 to vector<24x1xf32>
    %254 = arith.divf %252, %253 : vector<24x1xf32>
    %255 = vector.broadcast %254 : vector<24x1xf32> to vector<24x32xf32>
    %256 = arith.subf %246, %255 : vector<24x32xf32>
    %257 = arith.mulf %256, %256 : vector<24x32xf32>
    %cst_114 = arith.constant dense<0.000000e+00> : vector<24xf32>
    %258 = vector.multi_reduction <add>, %257, %cst_114 [1] : vector<24x32xf32> to vector<24xf32>
    %259 = vector.shape_cast %258 : vector<24xf32> to vector<24x1xf32>
    %cst_115 = arith.constant 3.200000e+01 : f32
    %260 = vector.broadcast %cst_115 : f32 to vector<24x1xf32>
    %261 = arith.divf %259, %260 : vector<24x1xf32>
    %262 = vector.broadcast %254 : vector<24x1xf32> to vector<24x32xf32>
    %263 = arith.subf %246, %262 : vector<24x32xf32>
    %cst_116 = arith.constant 9.99999996E-13 : f32
    %264 = vector.broadcast %cst_116 : f32 to vector<24x1xf32>
    %265 = arith.addf %261, %264 : vector<24x1xf32>
    %266 = math.rsqrt %265 : vector<24x1xf32>
    %267 = vector.broadcast %266 : vector<24x1xf32> to vector<24x32xf32>
    %268 = arith.mulf %263, %267 : vector<24x32xf32>
    %269 = vector.broadcast %248 : vector<1x32xf32> to vector<24x32xf32>
    %270 = arith.mulf %268, %269 : vector<24x32xf32>
    %271 = vector.broadcast %250 : vector<1x32xf32> to vector<24x32xf32>
    %272 = arith.addf %270, %271 : vector<24x32xf32>
    %273 = arith.truncf %272 : vector<24x32xf32> to vector<24x32xbf16>
    %c1_117 = arith.constant 1 : index
    %c0_118 = arith.constant 0 : index
    %c0_119 = arith.constant 0 : index
    %274 = vector.load %arg14[%c1_117, %c0_118, %c0_119] : memref<2x32x128xbf16, #tpu.memory_space<vmem>>, vector<1x32x128xbf16>
    %275 = vector.shape_cast %274 : vector<1x32x128xbf16> to vector<32x128xbf16>
    %cst_120 = arith.constant dense<0.000000e+00> : vector<24x128xf32>
    %276 = tpu.matmul %273, %275, %cst_120 {dimension_numbers = #tpu.dot_dimension_numbers<[1], [0], [0], [1], [0, 0, 1, 1], [], []>} : vector<24x32xbf16>, vector<32x128xbf16>, vector<24x128xf32> -> vector<24x128xf32>
    %c1_121 = arith.constant 1 : index
    %c0_122 = arith.constant 0 : index
    %c0_123 = arith.constant 0 : index
    %277 = vector.load %arg15[%c1_121, %c0_122, %c0_123] : memref<2x1x128xf32, #tpu.memory_space<vmem>>, vector<1x1x128xf32>
    %278 = vector.shape_cast %277 : vector<1x1x128xf32> to vector<1x128xf32>
    %279 = vector.broadcast %278 : vector<1x128xf32> to vector<24x128xf32>
    %280 = arith.addf %276, %279 : vector<24x128xf32>
    %281 = arith.mulf %280, %280 : vector<24x128xf32>
    %282 = arith.mulf %280, %281 : vector<24x128xf32>
    %cst_124 = arith.constant 4.471500e-02 : f32
    %283 = vector.broadcast %cst_124 : f32 to vector<24x128xf32>
    %284 = arith.mulf %283, %282 : vector<24x128xf32>
    %285 = arith.addf %280, %284 : vector<24x128xf32>
    %cst_125 = arith.constant 0.797884583 : f32
    %286 = vector.broadcast %cst_125 : f32 to vector<24x128xf32>
    %287 = arith.mulf %286, %285 : vector<24x128xf32>
    %288 = math.tanh %287 : vector<24x128xf32>
    %cst_126 = arith.constant 1.000000e+00 : f32
    %289 = vector.broadcast %cst_126 : f32 to vector<24x128xf32>
    %290 = arith.addf %289, %288 : vector<24x128xf32>
    %cst_127 = arith.constant 5.000000e-01 : f32
    %291 = vector.broadcast %cst_127 : f32 to vector<24x128xf32>
    %292 = arith.mulf %291, %290 : vector<24x128xf32>
    %293 = arith.mulf %280, %292 : vector<24x128xf32>
    %294 = arith.truncf %293 : vector<24x128xf32> to vector<24x128xbf16>
    %c1_128 = arith.constant 1 : index
    %c0_129 = arith.constant 0 : index
    %c0_130 = arith.constant 0 : index
    %295 = vector.load %arg16[%c1_128, %c0_129, %c0_130] : memref<2x128x32xbf16, #tpu.memory_space<vmem>>, vector<1x128x32xbf16>
    %296 = vector.shape_cast %295 : vector<1x128x32xbf16> to vector<128x32xbf16>
    %cst_131 = arith.constant dense<0.000000e+00> : vector<24x32xf32>
    %297 = tpu.matmul %294, %296, %cst_131 {dimension_numbers = #tpu.dot_dimension_numbers<[1], [0], [0], [1], [0, 0, 1, 1], [], []>} : vector<24x128xbf16>, vector<128x32xbf16>, vector<24x32xf32> -> vector<24x32xf32>
    %c1_132 = arith.constant 1 : index
    %c0_133 = arith.constant 0 : index
    %c0_134 = arith.constant 0 : index
    %298 = vector.load %arg17[%c1_132, %c0_133, %c0_134] : memref<2x1x32xf32, #tpu.memory_space<vmem>>, vector<1x1x32xf32>
    %299 = vector.shape_cast %298 : vector<1x1x32xf32> to vector<1x32xf32>
    %300 = vector.broadcast %299 : vector<1x32xf32> to vector<24x32xf32>
    %301 = arith.addf %297, %300 : vector<24x32xf32>
    %302 = arith.addf %272, %301 : vector<24x32xf32>
    %c1_135 = arith.constant 1 : index
    %c0_136 = arith.constant 0 : index
    %c0_137 = arith.constant 0 : index
    %303 = vector.load %arg18[%c1_135, %c0_136, %c0_137] : memref<2x1x32xf32, #tpu.memory_space<vmem>>, vector<1x1x32xf32>
    %304 = vector.shape_cast %303 : vector<1x1x32xf32> to vector<1x32xf32>
    %c1_138 = arith.constant 1 : index
    %c0_139 = arith.constant 0 : index
    %c0_140 = arith.constant 0 : index
    %305 = vector.load %arg19[%c1_138, %c0_139, %c0_140] : memref<2x1x32xf32, #tpu.memory_space<vmem>>, vector<1x1x32xf32>
    %306 = vector.shape_cast %305 : vector<1x1x32xf32> to vector<1x32xf32>
    %cst_141 = arith.constant dense<0.000000e+00> : vector<24xf32>
    %307 = vector.multi_reduction <add>, %302, %cst_141 [1] : vector<24x32xf32> to vector<24xf32>
    %308 = vector.shape_cast %307 : vector<24xf32> to vector<24x1xf32>
    %cst_142 = arith.constant 3.200000e+01 : f32
    %309 = vector.broadcast %cst_142 : f32 to vector<24x1xf32>
    %310 = arith.divf %308, %309 : vector<24x1xf32>
    %311 = vector.broadcast %310 : vector<24x1xf32> to vector<24x32xf32>
    %312 = arith.subf %302, %311 : vector<24x32xf32>
    %313 = arith.mulf %312, %312 : vector<24x32xf32>
    %cst_143 = arith.constant dense<0.000000e+00> : vector<24xf32>
    %314 = vector.multi_reduction <add>, %313, %cst_143 [1] : vector<24x32xf32> to vector<24xf32>
    %315 = vector.shape_cast %314 : vector<24xf32> to vector<24x1xf32>
    %cst_144 = arith.constant 3.200000e+01 : f32
    %316 = vector.broadcast %cst_144 : f32 to vector<24x1xf32>
    %317 = arith.divf %315, %316 : vector<24x1xf32>
    %318 = vector.broadcast %310 : vector<24x1xf32> to vector<24x32xf32>
    %319 = arith.subf %302, %318 : vector<24x32xf32>
    %cst_145 = arith.constant 9.99999996E-13 : f32
    %320 = vector.broadcast %cst_145 : f32 to vector<24x1xf32>
    %321 = arith.addf %317, %320 : vector<24x1xf32>
    %322 = math.rsqrt %321 : vector<24x1xf32>
    %323 = vector.broadcast %322 : vector<24x1xf32> to vector<24x32xf32>
    %324 = arith.mulf %319, %323 : vector<24x32xf32>
    %325 = vector.broadcast %304 : vector<1x32xf32> to vector<24x32xf32>
    %326 = arith.mulf %324, %325 : vector<24x32xf32>
    %327 = vector.broadcast %306 : vector<1x32xf32> to vector<24x32xf32>
    %328 = arith.addf %326, %327 : vector<24x32xf32>
    %329 = tpu.iota {dimensions = array<i32: 0>} : vector<8x24xi32>
    %330 = tpu.iota {dimensions = array<i32: 1>} : vector<8x24xi32>
    %c8_i32 = arith.constant 8 : i32
    %331 = vector.broadcast %c8_i32 : i32 to vector<8x24xi32>
    %332 = arith.muli %329, %331 : vector<8x24xi32>
    %333 = arith.cmpi eq, %330, %332 : vector<8x24xi32>
    %c3_i32 = arith.constant 3 : i32
    %334 = vector.broadcast %c3_i32 : i32 to vector<8x24xi32>
    %335 = arith.cmpi slt, %329, %334 : vector<8x24xi32>
    %336 = arith.andi %333, %335 : vector<8x24xi1>
    %cst_146 = arith.constant 1.000000e+00 : f32
    %cst_147 = arith.constant 0.000000e+00 : f32
    %337 = vector.broadcast %cst_146 : f32 to vector<8x24xf32>
    %338 = vector.broadcast %cst_147 : f32 to vector<8x24xf32>
    %339 = arith.select %336, %337, %338 : vector<8x24xi1>, vector<8x24xf32>
    %cst_148 = arith.constant dense<0.000000e+00> : vector<8x32xf32>
    %340 = tpu.matmul %339, %328, %cst_148 {dimension_numbers = #tpu.dot_dimension_numbers<[1], [0], [0], [1], [0, 0, 1, 1], [], []>} : vector<8x24xf32>, vector<24x32xf32>, vector<8x32xf32> -> vector<8x32xf32>
    %c0_149 = arith.constant 0 : index
    %c0_150 = arith.constant 0 : index
    %341 = vector.load %arg20[%c0_149, %c0_150] : memref<32x32xf32, #tpu.memory_space<vmem>>, vector<32x32xf32>
    %cst_151 = arith.constant dense<0.000000e+00> : vector<8x32xf32>
    %342 = tpu.matmul %340, %341, %cst_151 {dimension_numbers = #tpu.dot_dimension_numbers<[1], [0], [0], [1], [0, 0, 1, 1], [], []>} : vector<8x32xf32>, vector<32x32xf32>, vector<8x32xf32> -> vector<8x32xf32>
    %c0_152 = arith.constant 0 : index
    %c0_153 = arith.constant 0 : index
    %343 = vector.load %arg21[%c0_152, %c0_153] : memref<1x32xf32, #tpu.memory_space<vmem>>, vector<1x32xf32>
    %344 = vector.broadcast %343 : vector<1x32xf32> to vector<8x32xf32>
    %345 = arith.addf %342, %344 : vector<8x32xf32>
    %cst_154 = arith.constant 0.000000e+00 : f32
    %346 = vector.broadcast %cst_154 : f32 to vector<8x32xf32>
    %347 = arith.maximumf %345, %346 : vector<8x32xf32>
    %c0_155 = arith.constant 0 : index
    %c0_156 = arith.constant 0 : index
    %348 = vector.load %arg22[%c0_155, %c0_156] : memref<32x128xf32, #tpu.memory_space<vmem>>, vector<32x128xf32>
    %cst_157 = arith.constant dense<0.000000e+00> : vector<8x128xf32>
    %349 = tpu.matmul %347, %348, %cst_157 {dimension_numbers = #tpu.dot_dimension_numbers<[1], [0], [0], [1], [0, 0, 1, 1], [], []>} : vector<8x32xf32>, vector<32x128xf32>, vector<8x128xf32> -> vector<8x128xf32>
    %c0_158 = arith.constant 0 : index
    %c0_159 = arith.constant 0 : index
    %350 = vector.load %arg23[%c0_158, %c0_159] : memref<1x128xf32, #tpu.memory_space<vmem>>, vector<1x128xf32>
    %351 = vector.broadcast %350 : vector<1x128xf32> to vector<8x128xf32>
    %352 = arith.addf %349, %351 : vector<8x128xf32>
    %c0_160 = arith.constant 0 : index
    %c0_161 = arith.constant 0 : index
    %353 = vector.load %arg24[%c0_160, %c0_161] : memref<8x128xf32, #tpu.memory_space<vmem>>, vector<8x128xf32>
    tpu.vector_store %arg24[%c0_160, %c0_161], %352 {strides = array<i32>} : memref<8x128xf32, #tpu.memory_space<vmem>>, vector<8x128xf32>,
    return
  }
  func.func @transform_0(%arg0: i32) -> (i32, i32, i32) {
    %c0_i32 = arith.constant 0 : i32
    %c0_i32_0 = arith.constant 0 : i32
    %c0_i32_1 = arith.constant 0 : i32
    return %arg0, %c0_i32, %c0_i32_0 : i32, i32, i32
  }
  func.func @transform_1(%arg0: i32) -> (i32, i32, i32) {
    %c0_i32 = arith.constant 0 : i32
    %c0_i32_0 = arith.constant 0 : i32
    %c0_i32_1 = arith.constant 0 : i32
    return %arg0, %c0_i32, %c0_i32_0 : i32, i32, i32
  }
  func.func @transform_2(%arg0: i32) -> (i32, i32, i32) {
    %c0_i32 = arith.constant 0 : i32
    %c0_i32_0 = arith.constant 0 : i32
    %c0_i32_1 = arith.constant 0 : i32
    return %arg0, %c0_i32, %c0_i32_0 : i32, i32, i32
  }
  func.func @transform_3(%arg0: i32) -> (i32, i32) {
    %c0_i32 = arith.constant 0 : i32
    %c0_i32_0 = arith.constant 0 : i32
    %c0_i32_1 = arith.constant 0 : i32
    return %c0_i32, %c0_i32_0 : i32, i32
  }
  func.func @transform_4(%arg0: i32) -> (i32, i32) {
    %c0_i32 = arith.constant 0 : i32
    %c0_i32_0 = arith.constant 0 : i32
    %c0_i32_1 = arith.constant 0 : i32
    return %c0_i32, %c0_i32_0 : i32, i32
  }
  func.func @transform_5(%arg0: i32) -> (i32, i32) {
    %c0_i32 = arith.constant 0 : i32
    %c0_i32_0 = arith.constant 0 : i32
    %c0_i32_1 = arith.constant 0 : i32
    return %c0_i32, %c0_i32_0 : i32, i32
  }
  func.func @transform_6(%arg0: i32) -> (i32, i32) {
    %c0_i32 = arith.constant 0 : i32
    %c0_i32_0 = arith.constant 0 : i32
    %c0_i32_1 = arith.constant 0 : i32
    return %c0_i32, %c0_i32_0 : i32, i32
  }
  func.func @transform_7(%arg0: i32) -> (i32, i32, i32) {
    %c0_i32 = arith.constant 0 : i32
    %c0_i32_0 = arith.constant 0 : i32
    %c0_i32_1 = arith.constant 0 : i32
    %c0_i32_2 = arith.constant 0 : i32
    return %c0_i32, %c0_i32_0, %c0_i32_1 : i32, i32, i32
  }
  func.func @transform_8(%arg0: i32) -> (i32, i32, i32) {
    %c0_i32 = arith.constant 0 : i32
    %c0_i32_0 = arith.constant 0 : i32
    %c0_i32_1 = arith.constant 0 : i32
    %c0_i32_2 = arith.constant 0 : i32
    return %c0_i32, %c0_i32_0, %c0_i32_1 : i32, i32, i32
  }
  func.func @transform_9(%arg0: i32) -> (i32, i32, i32) {
    %c0_i32 = arith.constant 0 : i32
    %c0_i32_0 = arith.constant 0 : i32
    %c0_i32_1 = arith.constant 0 : i32
    %c0_i32_2 = arith.constant 0 : i32
    return %c0_i32, %c0_i32_0, %c0_i32_1 : i32, i32, i32
  }
  func.func @transform_10(%arg0: i32) -> (i32, i32, i32) {
    %c0_i32 = arith.constant 0 : i32
    %c0_i32_0 = arith.constant 0 : i32
    %c0_i32_1 = arith.constant 0 : i32
    %c0_i32_2 = arith.constant 0 : i32
    return %c0_i32, %c0_i32_0, %c0_i32_1 : i32, i32, i32
  }
  func.func @transform_11(%arg0: i32) -> (i32, i32, i32) {
    %c0_i32 = arith.constant 0 : i32
    %c0_i32_0 = arith.constant 0 : i32
    %c0_i32_1 = arith.constant 0 : i32
    %c0_i32_2 = arith.constant 0 : i32
    return %c0_i32, %c0_i32_0, %c0_i32_1 : i32, i32, i32
  }
  func.func @transform_12(%arg0: i32) -> (i32, i32, i32) {
    %c0_i32 = arith.constant 0 : i32
    %c0_i32_0 = arith.constant 0 : i32
    %c0_i32_1 = arith.constant 0 : i32
    %c0_i32_2 = arith.constant 0 : i32
    return %c0_i32, %c0_i32_0, %c0_i32_1 : i32, i32, i32
  }
  func.func @transform_13(%arg0: i32) -> (i32, i32, i32) {
    %c0_i32 = arith.constant 0 : i32
    %c0_i32_0 = arith.constant 0 : i32
    %c0_i32_1 = arith.constant 0 : i32
    %c0_i32_2 = arith.constant 0 : i32
    return %c0_i32, %c0_i32_0, %c0_i32_1 : i32, i32, i32
  }
  func.func @transform_14(%arg0: i32) -> (i32, i32, i32) {
    %c0_i32 = arith.constant 0 : i32
    %c0_i32_0 = arith.constant 0 : i32
    %c0_i32_1 = arith.constant 0 : i32
    %c0_i32_2 = arith.constant 0 : i32
    return %c0_i32, %c0_i32_0, %c0_i32_1 : i32, i32, i32
  }
  func.func @transform_15(%arg0: i32) -> (i32, i32, i32) {
    %c0_i32 = arith.constant 0 : i32
    %c0_i32_0 = arith.constant 0 : i32
    %c0_i32_1 = arith.constant 0 : i32
    %c0_i32_2 = arith.constant 0 : i32
    return %c0_i32, %c0_i32_0, %c0_i32_1 : i32, i32, i32
  }
  func.func @transform_16(%arg0: i32) -> (i32, i32, i32) {
    %c0_i32 = arith.constant 0 : i32
    %c0_i32_0 = arith.constant 0 : i32
    %c0_i32_1 = arith.constant 0 : i32
    %c0_i32_2 = arith.constant 0 : i32
    return %c0_i32, %c0_i32_0, %c0_i32_1 : i32, i32, i32
  }
  func.func @transform_17(%arg0: i32) -> (i32, i32, i32) {
    %c0_i32 = arith.constant 0 : i32
    %c0_i32_0 = arith.constant 0 : i32
    %c0_i32_1 = arith.constant 0 : i32
    %c0_i32_2 = arith.constant 0 : i32
    return %c0_i32, %c0_i32_0, %c0_i32_1 : i32, i32, i32
  }
  func.func @transform_18(%arg0: i32) -> (i32, i32, i32) {
    %c0_i32 = arith.constant 0 : i32
    %c0_i32_0 = arith.constant 0 : i32
    %c0_i32_1 = arith.constant 0 : i32
    %c0_i32_2 = arith.constant 0 : i32
    return %c0_i32, %c0_i32_0, %c0_i32_1 : i32, i32, i32
  }
  func.func @transform_19(%arg0: i32) -> (i32, i32) {
    %c0_i32 = arith.constant 0 : i32
    %c0_i32_0 = arith.constant 0 : i32
    %c0_i32_1 = arith.constant 0 : i32
    return %c0_i32, %c0_i32_0 : i32, i32
  }
  func.func @transform_20(%arg0: i32) -> (i32, i32) {
    %c0_i32 = arith.constant 0 : i32
    %c0_i32_0 = arith.constant 0 : i32
    %c0_i32_1 = arith.constant 0 : i32
    return %c0_i32, %c0_i32_0 : i32, i32
  }
  func.func @transform_21(%arg0: i32) -> (i32, i32) {
    %c0_i32 = arith.constant 0 : i32
    %c0_i32_0 = arith.constant 0 : i32
    %c0_i32_1 = arith.constant 0 : i32
    return %c0_i32, %c0_i32_0 : i32, i32
  }
  func.func @transform_22(%arg0: i32) -> (i32, i32) {
    %c0_i32 = arith.constant 0 : i32
    %c0_i32_0 = arith.constant 0 : i32
    %c0_i32_1 = arith.constant 0 : i32
    return %c0_i32, %c0_i32_0 : i32, i32
  }
  func.func @transform_23(%arg0: i32) -> (i32, i32) {
    %c0_i32 = arith.constant 0 : i32
    %c0_i32_0 = arith.constant 0 : i32
    return %arg0, %c0_i32 : i32, i32
  }
}

</mosaic_0001>

<bundles_post_ra>
// kernel: causal_sent_forward.1
= control target key start
LH: loop header
LB: loop body
LE: loop exit
PB: predicated region body
PF: predicated region fallthrough
CT: control target
= control target key end

     0   :  { %s4217_s0 = inlined_call_operand.vmem [shape: s32[2,24,1], index: 0, kind: input, shape index: {}]   ;;  %s4218_s1 = inlined_call_operand.vmem [shape: f32[2,24,1], index: 1, kind: input, shape index: {}]   ;;  %s4219_s2 = inlined_call_operand.vmem [shape: f32[2,1,24], index: 2, kind: input, shape index: {}]   ;;  %s4220_s3 = inlined_call_operand.vmem [shape: bf16[64,32], index: 3, kind: input, shape index: {}]   ;;  %s4221_s4 = inlined_call_operand.vmem [shape: f32[8,32], index: 4, kind: input, shape index: {}]   ;;  %s4222_s5 = inlined_call_operand.vmem [shape: f32[1,32], index: 5, kind: input, shape index: {}]   ;;  %s4223_s6 = inlined_call_operand.vmem [shape: f32[1,32], index: 6, kind: input, shape index: {}]   ;;  %s4224_s7 = inlined_call_operand.vmem [shape: bf16[2,32,96], index: 7, kind: input, shape index: {}]   ;;  %s4225_s8 = inlined_call_operand.vmem [shape: f32[2,1,96], index: 8, kind: input, shape index: {}]   ;;  %s4226_s9 = inlined_call_operand.vmem [shape: bf16[2,32,32], index: 9, kind: input, shape index: {}]   ;;  %s4227_s10 = inlined_call_operand.vmem [shape: f32[2,1,32], index: 10, kind: input, shape index: {}]   ;;  %s4228_s11 = inlined_call_operand.vmem [shape: f32[2,1,32], index: 11, kind: input, shape index: {}]   ;;  %s4229_s12 = inlined_call_operand.vmem [shape: f32[2,1,32], index: 12, kind: input, shape index: {}]   ;;  %s4230_s13 = inlined_call_operand.vmem [shape: bf16[2,32,128], index: 13, kind: input, shape index: {}]   ;;  %s4231_s14 = inlined_call_operand.vmem [shape: f32[2,1,128], index: 14, kind: input, shape index: {}]   ;;  %s4232_s15 = inlined_call_operand.vmem [shape: bf16[2,128,32], index: 15, kind: input, shape index: {}]   ;;  %s4233_s16 = inlined_call_operand.vmem [shape: f32[2,1,32], index: 16, kind: input, shape index: {}]   ;;  %s4234_s17 = inlined_call_operand.vmem [shape: f32[2,1,32], index: 17, kind: input, shape index: {}]   ;;  %s4235_s18 = inlined_call_operand.vmem [shape: f32[2,1,32], index: 18, kind: input, shape index: {}]   ;;  %s4236_s19 = inlined_call_operand.vmem [shape: f32[32,32], index: 19, kind: input, shape index: {}]   ;;  %s4237_s20 = inlined_call_operand.vmem [shape: f32[1,32], index: 20, kind: input, shape index: {}]   ;;  %s4238_s21 = inlined_call_operand.vmem [shape: f32[32,128], index: 21, kind: input, shape index: {}]   ;;  %s4239_s22 = inlined_call_operand.vmem [shape: f32[1,128], index: 22, kind: input, shape index: {}]   ;;  %s4240_s23 = inlined_call_operand.vmem [shape: f32[16,128], index: 23, kind: output, shape index: {}]  }
   0x1   :  { %4249 = sst [smem:[#allocation2_spill]] %s4217_s0 }
   0x2   :  { %4250 = sst [smem:[#allocation3_spill]] %s4218_s1 }
   0x3   :  { %4251 = sst [smem:[#allocation4_spill]] %s4219_s2 }
   0x4   :  { %4252 = sst [smem:[#allocation5_spill]] %s4220_s3 }
   0x5   :  { %4253 = sst [smem:[#allocation6_spill]] %s4221_s4  ;;  %s3742_s4 = smov 0  }
   0x6   :  { %4254 = sst [smem:[#allocation7_spill]] %s4222_s5 }
   0x7   :  { %4255 = sst [smem:[#allocation8_spill]] %s4223_s6 }
   0x8   :  { %4256 = sst [smem:[#allocation9_spill]] %s4224_s7 }
   0x9 LB: > { %s2996_s30 = sadd.s32 4294967295, %s3609_s4   ;;  %p3000_p0 = scmp.ge.s32.totalorder %s3609_s4, 1  ;;  %s3609_s4 = sphi %s3742_s4, %s33_s4  }
   0xa   : > { %p655_p1 = scmp.lt.s32.totalorder %s3609_s4, 3 }
   0xc   : > { %p656_p2 = pnand %p3000_p0, %p655_p1 }
   0xd   : > { %p726_p3 = scmp.lt.s32.totalorder (!%p656_p2), %s2996_s30, 1  ;;  %v3611_v0 = vmov (!%p656_p2), 0   ;;  %s4257_s5 = sld [smem:[#allocation5_spill]] (!%p656_p2)  ;;  %v747_v8 = vlaneseq (!%p656_p2)  ;;  %v3612_v12 = vmov (!%p656_p2), 0.0   ;;  %vm802_vm3 = vcmask (!%p656_p2), 523264  }
   0xe   : > { %659 = sbr.rel (%p656_p2) target bundleno = 6545 (0x1991), region = 112  ;;  %3469 = vset.pattern.permute.xlu0 (!%p656_p2), %v3611_v0  ;;  %3470 = vset.pattern.permute.xlu1 (!%p656_p2), %v3611_v0  ;;  %s4258_s7 = sld [smem:[#allocation2_spill]] (!%p656_p2)  ;;  %vm859_vm4 = vcmask (!%p656_p2), 261120   ;;  %vm1036_vm5 = vcmask (!%p656_p2), 130048   ;;  %vm1097_vm9 = vcmask (!%p656_p2), 195584   ;;  %vm1144_vm10 = vcmask (!%p656_p2), 1043456  }
   0xf   : > { %v3771_v9 = vand.u32 (!%p656_p2), 127, %v747_v8  ;;  %s4259_s26 = sld [smem:[#allocation6_spill]] (!%p656_p2)  ;;  %s4261_s24 = sld [smem:[#allocation7_spill]] (!%p656_p2)  ;;  %vm3621_vm11 = vmmov (!%p656_p2), 0  }
  0x10   : > { %s3614_s29 = smov (!%p656_p2), 80   ;;  %s3615_s1 = smov (!%p656_p2), 112  }
  0x11   : > { %s4264_s6 = sld [smem:[#allocation4_spill]] (!%p656_p2)  ;;  %s4247_s3 = smov (!%p656_p2), 64  }
  0x12   : > { %s4245_s0 = smov (!%p656_p2), 48  }
  0x13   : > { %v3481_v1 = vld [vmem:[%s4257_s5] sm:$0xff] (!%p656_p2)   ;;  %v3482_v2 = vld [vmem:[%s4257_s5 + $0x8] sm:$0xff] (!%p656_p2)   ;;  %v3483_v6 = vld [vmem:[%s4257_s5 + $0x10] sm:$0xff] (!%p656_p2)  }
  0x14   : > { %3227 = vmatprep.subr.bf16.mxu0 (!%p656_p2), %v3481_v1  ;;  %v3484_v7 = vld [vmem:[%s4257_s5 + $0x18] sm:$0xff] (!%p656_p2)  }
  0x15   : > { %s4269_s30 = smov (!%p726_p3, %s2996_s30), 1  ;;  %3228 = vmatpush3.bf16.msra.mxu0 %v3481_v1  ;;  %v777_v19 = vld [vmem:[%s4259_s26] sm:$0xff]  ;;  %s4262_s26 = sld [smem:[#allocation8_spill]] }
  0x16   : > { %s3449_s2 = smul.u32 24, %s4269_s30  ;;  %3229 = vmatprep.subr.bf16.mxu0 %v3482_v2  ;;  %v3013_v57 = vld [vmem:[%s4261_s24] ss:$0 sm:$0xff]  ;;  %s4263_s24 = sld [smem:[#allocation3_spill]] }
  0x17   : > { %s738_s27 = scalar_lea.vmem %s4264_s6, %s4269_s30  ;;  %s4243_s6 = smov 16  }
  0x18   : > { %s730_s28 = scalar_lea.vmem %s4258_s7, %s3449_s2  ;;  %s4260_s7 = sld [smem:[#allocation9_spill]] }
  0x19   : > { %v744_v3 = vld [vmem:[%s730_s28] sm:$0xff]  ;;  %v745_v4 = vld [vmem:[%s730_s28 + $0x8] sm:$0xff]  ;;  %v746_v5 = vld [vmem:[%s730_s28 + $0x10] sm:$0xff]  ;;  %3230 = vmatpush3.bf16.msra.mxu0 %v3482_v2  ;;  %s3613_s28 = smov 96  }
  0x1a   : > { %750 = vperm.xlu0 %3469, %v744_v3   ;;  %756 = vperm.xlu1 %3470, %v746_v5  }
  0x1b   : > { %3231 = vmatprep.subr.bf16.mxu0 %v3483_v6  ;;  %v3014_v62 = vld [vmem:[%s4262_s26] ss:$0 sm:$0xff] }
  0x1c   : > { %s735_s25 = scalar_lea.vmem %s4263_s24, %s3449_s2  ;;  %s4267_s24 = smov 16  }
  0x1d   : > { %3232 = vmatpush3.bf16.msra.mxu0 %v3483_v6 }
  0x1e   : > { %753 = vperm.xlu0 %3469, %v745_v4   ;;  %3233 = vmatprep.subr.bf16.mxu0 %v3484_v7  ;;  %v3485_v45 = vld [vmem:[%s4260_s7] sm:$0xff]   ;;  %v3486_v46 = vld [vmem:[%s4260_s7 + $0x8] sm:$0xff]  }
  0x1f   : > { %3239 = vmatprep.subr.bf16.mxu1 %v3485_v45 }
  0x20   : > { %3240 = vmatpush3.bf16.msra.mxu1 %v3485_v45 }
  0x21   : > { %3234 = vmatpush3.bf16.msra.mxu0 %v3484_v7  ;;  %3241 = vmatprep.subr.bf16.mxu1 %v3486_v46 }
  0x24   : > { %3242 = vmatpush3.bf16.msra.mxu1 %v3486_v46 }
  0x99   : > { %v751_v10 = vpop.permute.xlu0 %750  ;;  %v757_v11 = vpop.permute.xlu1 %756 }
  0x9a   : > { %vm760_vm0 = vcmp.eq.s32.totalorder %v3771_v9, %v757_v11  ;;  %vm758_vm1 = vcmp.eq.s32.totalorder %v3771_v9, %v751_v10  ;;  %v3016_v10 = vld [vmem:[%s4225_s8] ss:$0 sm:$0xff] }
  0x9b   : > { %v3006_v13 = vsel %vm760_vm0, 1.0, %v3612_v12  ;;  %v3004_v15 = vsel %vm758_vm1, 1.0, %v3612_v12 }
  0x9c   : > { %v768_v17 = vpack.c.bf16 %v3006_v13, %v3006_v13 }
  0x9d   : > { %v754_v14 = vpop.permute.xlu0 %753 }
  0x9e   : > { %vm759_vm2 = vcmp.eq.s32.totalorder %v3771_v9, %v754_v14 }
  0x9f   : > { %v3005_v16 = vsel %vm759_vm2, 1.0, %v3612_v12 }
  0xa0   : > { %v767_v18 = vpack.c.bf16 %v3005_v16, %v3004_v15 }
  0xa2   : > { %3235 = vmatprep.mubr.msk.bf16.mxu0 %vm802_vm3, %v767_v18 }
  0xa3   : > { %3236 = vmatmul.mubr.msk.bf16.vlgmr.msra.gmra.mrb[0].mxu0 %vm802_vm3, %v768_v17 }
 0x176   : > { %v3237_v20 = vpop.f32.mrb[0].mxu0 }
 0x177   : > { %v843_v21 = vpop.f32.mrb[1].mxu0  ;;  %v852_v27 = vadd.f32 %v3237_v20, %v777_v19 }
 0x178   : > { %v844_v22 = vadd.f32 %v843_v21, %v777_v19  ;;  %v3238_v23 = vpop.f32.mrb[2].mxu0  ;;  %v918_v21 = vld [vmem:[%s735_s25] sm:$0xff] }
 0x179   : > { %v846_v24 = vpop.f32.mrb[3].mxu0  ;;  %v866_v29 = vsel %vm859_vm4, %v852_v27, 0.0  ;;  %v920_v23 = vld [vmem:[%s735_s25 + $0x10] sm:$0xff] }
 0x17a   : > { %v847_v25 = vadd.f32 %v846_v24, %v777_v19  ;;  %v860_v26 = vsel %vm859_vm4, %v844_v22, 0.0 }
 0x17b   : > { %861 = vadd.xlane.f32.xlu1 %v860_v26 }
 0x17c   : > { %v863_v28 = vsel %vm859_vm4, %v847_v25, 0.0 }
 0x17d   : > { %864 = vadd.xlane.f32.xlu0 %v863_v28 }
 0x181   : > { %867 = vadd.xlane.f32.xlu0 %v866_v29 }
 0x208   : > { %v862_v30 = vpop.xlane.xlu1 %861 }
 0x209   : > { %v870_v31 = vmul.f32 0.03125, %v862_v30 }
 0x20a   : > { %v865_v32 = vpop.xlane.xlu0 %864 }
 0x20b   : > { %v873_v33 = vsub.f32 %v844_v22, %v870_v31  ;;  %v871_v34 = vmul.f32 0.03125, %v865_v32  ;;  %v919_v22 = vld [vmem:[%s735_s25 + $0x8] sm:$0xff] }
 0x20d   : > { %v874_v35 = vsub.f32 %v847_v25, %v871_v34  ;;  %v876_v36 = vmul.f32 %v873_v33, %v873_v33 }
 0x20e   : > { %v868_v37 = vpop.xlane.xlu0 %867 }
 0x20f   : > { %v872_v38 = vmul.f32 0.03125, %v868_v37  ;;  %v879_v39 = vsel %vm859_vm4, %v876_v36, 0.0  ;;  %v877_v40 = vmul.f32 %v874_v35, %v874_v35 }
 0x210   : > { %880 = vadd.xlane.f32.xlu1 %v879_v39  ;;  %v3616_v39 = vmov -1e+09  }
 0x211   : > { %v875_v41 = vsub.f32 %v852_v27, %v872_v38  ;;  %v882_v42 = vsel %vm859_vm4, %v877_v40, 0.0 }
 0x212   : > { %883 = vadd.xlane.f32.xlu0 %v882_v42 }
 0x213   : > { %v878_v43 = vmul.f32 %v875_v41, %v875_v41 }
 0x215   : > { %v885_v44 = vsel %vm859_vm4, %v878_v43, 0.0 }
 0x216   : > { %886 = vadd.xlane.f32.xlu1 %v885_v44 }
 0x29d   : > { %v881_v47 = vpop.xlane.xlu1 %880 }
 0x29e   : > { %v888_v48 = vmul.f32 0.03125, %v881_v47 }
 0x29f   : > { %v884_v49 = vpop.xlane.xlu0 %883 }
 0x2a0   : > { %v891_v50 = vadd.f32 1e-12, %v888_v48  ;;  %v889_v51 = vmul.f32 0.03125, %v884_v49 }
 0x2a2   : > { %3513 = vrsqrt.f32 %v891_v50  ;;  %v892_v52 = vadd.f32 1e-12, %v889_v51 }
 0x2a3   : > { %v887_v53 = vpop.xlane.xlu1 %886 }
 0x2a4   : > { %3515 = vrsqrt.f32 %v892_v52  ;;  %v890_v54 = vmul.f32 0.03125, %v887_v53 }
 0x2a6   : > { %v893_v55 = vadd.f32 1e-12, %v890_v54 }
 0x2a8   : > { %3517 = vrsqrt.f32 %v893_v55 }
 0x2ac   : > { %v3514_v56 = vpop.eup %3513 }
 0x2ad   : > { %v897_v58 = vmul.f32 %v3514_v56, %v873_v33 }
 0x2ae   : > { %v3516_v59 = vpop.eup %3515 }
 0x2af   : > { %v898_v60 = vmul.f32 %v3516_v59, %v874_v35  ;;  %v906_v61 = vmul.f32 %v3013_v57, %v897_v58  ;;  %v3015_v35 = vld [vmem:[%s738_s27] ss:$0 sm:$0xff] }
 0x2b1   : > { %v907_v63 = vmul.f32 %v3013_v57, %v898_v60  ;;  %v3800_v2 = vadd.f32 %v3014_v62, %v906_v61 }
 0x2b2   : > { %v3518_v0 = vpop.eup %3517 }
 0x2b3   : > { %v899_v1 = vmul.f32 %v3518_v0, %v875_v41  ;;  %v3802_v3 = vadd.f32 %v3014_v62, %v907_v63 }
 0x2b5   : > { %v908_v4 = vmul.f32 %v3013_v57, %v899_v1  ;;  %v949_v5 = vpack.c.bf16 %v3802_v3, %v3800_v2 }
 0x2b7   : > { %v3806_v6 = vadd.f32 %v3014_v62, %v908_v4  ;;  %3243 = vmatprep.mubr.msk.bf16.mxu1 %vm859_vm4, %v949_v5 }
 0x2b9   : > { %v950_v7 = vpack.c.bf16 %v3806_v6, %v3806_v6 }
 0x2bb   : > { %3244 = vmatmul.mubr.msk.bf16.vlgmr.msra.gmra.mrb[0].mxu1 %vm859_vm4, %v950_v7 }
 0x38e   : > { %v3245_v11 = vpop.f32.mrb[0].mxu1 }
 0x38f   : > { %v1023_v13 = vadd.f32 %v3245_v11, %v3016_v10  ;;  %v1014_v14 = vpop.f32.mrb[1].mxu1 }
 0x390   : > { %v3246_v15 = vpop.f32.mrb[2].mxu1  ;;  %v1015_v18 = vadd.f32 %v3016_v10, %v1014_v14 }
 0x391   : > { %v3815_v16 = vpack.c.bf16 %v1023_v13, %v1023_v13  ;;  %v1017_v17 = vpop.f32.mrb[3].mxu1 }
 0x392   : > { %v1018_v19 = vadd.f32 %v3016_v10, %v1017_v17 }
 0x393   : > { %1034 = vrot.lane.b32.xlu1 %v3815_v16, %s3613_s28 }
 0x394   : > { %v3819_v20 = vpack.c.bf16 %v1018_v19, %v1015_v18 }
 0x396   : > { %1032 = vrot.lane.b32.xlu0 %v3819_v20, %s3613_s28  ;;  %3251 = vmatprep.mubr.msk.bf16.mxu1 %vm1036_vm5, %v3819_v20 }
 0x397   : > { %1200 = vrot.lane.b32.xlu1 %v3819_v20, %s3614_s29 }
 0x39a   : > { %1202 = vrot.lane.b32.xlu0 %v3815_v16, %s3614_s29 }
 0x39b   : > { %1196 = vrot.lane.b32.xlu1 %v3819_v20, %s3615_s1 }
 0x39e   : > { %1198 = vrot.lane.b32.xlu0 %v3815_v16, %s3615_s1 }
 0x39f   : > { %924 = vperm.xlu1 %3470, %v918_v21  }
 0x3a2   : > { %929 = vperm.xlu0 %3469, %v919_v22  }
 0x3a3   : > { %934 = vperm.xlu1 %3470, %v920_v23  }
 0x405   : > { %v1035_v24 = vpop.permute.xlu1 %1034 }
 0x406   : > { %v1047_v31 = vsel %vm1036_vm5, %v1035_v24, 0 }
 0x408   : > { %v1033_v25 = vpop.permute.xlu0 %1032 }
 0x409   : > { %v1044_v26 = vsel %vm1036_vm5, %v1033_v25, 0  ;;  %v1201_v27 = vpop.permute.xlu1 %1200  ;;  %3437 = vmatprep.subr.msk.bf16.mxu1 %vm1036_vm5, %v1033_v25 }
 0x40a   : > { %v1211_v28 = vsel %vm1036_vm5, %v1201_v27, 0  ;;  %3248 = vmatpush3.bf16.xpose.msra.mxu1 %v1044_v26  ;;  %3440 = vmatprep.subr.msk.bf16.mxu0 %vm1036_vm5, %v1201_v27 }
 0x40b   : > { %3438 = vmatprep.subr.msk.bf16.mxu1 %vm1036_vm5, %v1035_v24  ;;  %3264 = vmatpush3.bf16.xpose.msra.mxu0 %v1211_v28 }
 0x40c   : > { %v1203_v29 = vpop.permute.xlu0 %1202 }
 0x40d   : > { %v1197_v30 = vpop.permute.xlu1 %1196  ;;  %3441 = vmatprep.subr.msk.bf16.mxu0 %vm1036_vm5, %v1203_v29  ;;  %v1214_v32 = vsel %vm1036_vm5, %v1203_v29, 0 }
 0x40e   : > { %3267 = vmatprep.mubr.msk.bf16.mxu0 %vm1036_vm5, %v1197_v30 }
 0x410   : > { %v1199_v33 = vpop.permute.xlu0 %1198 }
 0x412   : > { %3250 = vmatpush3.bf16.xpose.msra.mxu1 %v1047_v31 }
 0x413   : > { %3266 = vmatpush3.bf16.xpose.msra.mxu0 %v1214_v32 }
 0x419   : > { %3252 = vmatmul.mubr.msk.bf16.vlgmr.msra.gmra.mrb[4].mxu1 %vm1036_vm5, %v3815_v16 }
 0x41a   : > { %3268 = vmatmul.mubr.msk.bf16.vlgmr.msra.gmra.mrb[4].mxu0 %vm1036_vm5, %v1199_v33 }
 0x41e   : > { %v925_v34 = vpop.permute.xlu1 %924 }
 0x41f   : > { %vm943_vm6 = vcmp.eq.f32.partialorder %v925_v34, %v3015_v35 }
 0x420   : > { %v3854_v40 = vsel %vm943_vm6, 0.0, %v3616_v39 }
 0x421   : > { %v930_v36 = vpop.permute.xlu0 %929 }
 0x422   : > { %v935_v37 = vpop.permute.xlu1 %934  ;;  %vm944_vm7 = vcmp.eq.f32.partialorder %v930_v36, %v3015_v35 }
 0x423   : > { %vm945_vm8 = vcmp.eq.f32.partialorder %v935_v37, %v3015_v35  ;;  %v3857_v46 = vsel %vm944_vm7, 0.0, %v3616_v39 }
 0x424   : > { %v3859_v47 = vsel %vm945_vm8, 0.0, %v3616_v39 }
 0x4ec   : > { %v3253_v38 = vpop.f32.mrb[4].mxu1 }
 0x4ed   : > { %v1083_v41 = vpop.f32.mrb[5].mxu1  ;;  %v3269_v42 = vpop.f32.mrb[4].mxu0  ;;  %v1092_v50 = vadd.f32 %v3253_v38, %v3859_v47 }
 0x4ee   : > { %v1084_v43 = vadd.f32 %v1083_v41, %v3854_v40  ;;  %v3254_v44 = vpop.f32.mrb[6].mxu1  ;;  %v1250_v45 = vpop.f32.mrb[5].mxu0  ;;  %v1259_v59 = vadd.f32 %v3269_v42, %v3859_v47 }
 0x4ef   : > { %v1086_v48 = vpop.f32.mrb[7].mxu1  ;;  %v3270_v49 = vpop.f32.mrb[6].mxu0  ;;  %v1251_v56 = vadd.f32 %v1250_v45, %v3854_v40  ;;  %v1104_v57 = vsel %vm1097_vm9, %v1092_v50, -inf }
 0x4f0   : > { %v1087_v51 = vadd.f32 %v1086_v48, %v3857_v46  ;;  %v1253_v52 = vpop.f32.mrb[7].mxu0  ;;  %v1098_v53 = vsel %vm1097_vm9, %v1084_v43, -inf  ;;  %v1270_v61 = vsel %vm1097_vm9, %v1259_v59, -inf }
 0x4f1   : > { %1099 = vmax.xlane.f32.xlu0 %v1098_v53  ;;  %v1254_v54 = vadd.f32 %v1253_v52, %v3857_v46  ;;  %v1264_v60 = vsel %vm1097_vm9, %v1251_v56, -inf }
 0x4f2   : > { %v1101_v55 = vsel %vm1097_vm9, %v1087_v51, -inf }
 0x4f3   : > { %1102 = vmax.xlane.f32.xlu1 %v1101_v55  ;;  %v1267_v58 = vsel %vm1097_vm9, %v1254_v54, -inf }
 0x4f5   : > { %1105 = vmax.xlane.f32.xlu0 %v1104_v57 }
 0x4f7   : > { %1268 = vmax.xlane.f32.xlu1 %v1267_v58 }
 0x4f9   : > { %1265 = vmax.xlane.f32.xlu0 %v1264_v60 }
 0x4fd   : > { %1271 = vmax.xlane.f32.xlu0 %v1270_v61 }
 0x508   : > { %1133 = vrot.lane.b32.xlu1 %v3819_v20, %s4247_s3 }
 0x57e   : > { %v1100_v62 = vpop.xlane.xlu0 %1099 }
 0x57f   : > { %v1107_v0 = vsub.f32 %v1084_v43, %v1100_v62 }
 0x580   : > { %v1103_v63 = vpop.xlane.xlu1 %1102 }
 0x581   : > { %v1110_v7 = vmul.f32 1.442695, %v1107_v0  ;;  %v1108_v18 = vsub.f32 %v1087_v51, %v1103_v63 }
 0x582   : > { %v1106_v1 = vpop.xlane.xlu0 %1105 }
 0x583   : > { %v1109_v4 = vsub.f32 %v1092_v50, %v1106_v1  ;;  %v1112_v23 = vmul.f32 1.442695, %v1108_v18 }
 0x584   : > { %v1269_v5 = vpop.xlane.xlu1 %1268 }
 0x585   : > { %v1114_v10 = vmul.f32 1.442695, %v1109_v4  ;;  %v1274_v33 = vsub.f32 %v1254_v54, %v1269_v5 }
 0x586   : > { %v1266_v11 = vpop.xlane.xlu0 %1265 }
 0x587   : > { %3519 = vpow2.f32 %v1114_v10  ;;  %v1273_v14 = vsub.f32 %v1251_v56, %v1266_v11  ;;  %v1278_v34 = vmul.f32 1.442695, %v1274_v33  ;;  %v3487_v10 = vld [vmem:[%s4226_s9] sm:$0xff]   ;;  %v3488_v11 = vld [vmem:[%s4226_s9 + $0x8] sm:$0xff]  }
 0x588   : > { %v1134_v13 = vpop.permute.xlu1 %1133  ;;  %3521 = vpow2.f32 %v1110_v7 }
 0x589   : > { %3255 = vmatprep.subr.bf16.mxu1 %v1134_v13  ;;  %v1276_v19 = vmul.f32 1.442695, %v1273_v14 }
 0x58a   : > { %3256 = vmatpush3.bf16.msra.mxu1 %v1134_v13  ;;  %v1272_v15 = vpop.xlane.xlu0 %1271 }
 0x58b   : > { %v1275_v17 = vsub.f32 %v1259_v59, %v1272_v15 }
 0x58d   : > { %v1280_v21 = vmul.f32 1.442695, %v1275_v17 }
 0x58f   : > { %3523 = vpow2.f32 %v1280_v21 }
 0x590   : > { %3525 = vpow2.f32 %v1276_v19 }
 0x591   : > { %v3520_v22 = vpop.eup %3519  ;;  %3527 = vpow2.f32 %v1112_v23 }
 0x592   : > { %v1122_v24 = vsel %vm1097_vm9, %v3520_v22, 0.0  ;;  %v3522_v25 = vpop.eup %3521  ;;  %3529 = vpow2.f32 %v1278_v34 }
 0x593   : > { %1123 = vadd.xlane.f32.xlu1 %v1122_v24  ;;  %v1116_v26 = vsel %vm1097_vm9, %v3522_v25, 0.0 }
 0x597   : > { %1117 = vadd.xlane.f32.xlu1 %v1116_v26 }
 0x599   : > { %v3524_v27 = vpop.eup %3523 }
 0x59a   : > { %v1288_v28 = vsel %vm1097_vm9, %v3524_v27, 0.0  ;;  %v3526_v29 = vpop.eup %3525 }
 0x59b   : > { %1289 = vadd.xlane.f32.xlu0 %v1288_v28  ;;  %v1282_v30 = vsel %vm1097_vm9, %v3526_v29, 0.0  ;;  %v3528_v31 = vpop.eup %3527 }
 0x59c   : > { %v1119_v32 = vsel %vm1097_vm9, %v3528_v31, 0.0  ;;  %v3530_v35 = vpop.eup %3529 }
 0x59d   : > { %v1285_v36 = vsel %vm1097_vm9, %v3530_v35, 0.0 }
 0x59f   : > { %1283 = vadd.xlane.f32.xlu0 %v1282_v30 }
 0x5a3   : > { %1120 = vadd.xlane.f32.xlu0 %v1119_v32 }
 0x5a8   : > { %1299 = vrot.lane.b32.xlu1 %v3819_v20, %s4245_s0 }
 0x5b9   : > { %1135 = vrot.lane.b32.xlu0 %v3815_v16, %s4247_s3 }
 0x5cc   : > { %1286 = vadd.xlane.f32.xlu1 %v1285_v36 }
 0x5dd   : > { %1301 = vrot.lane.b32.xlu1 %v3815_v16, %s4245_s0  ;;  %s3003_s0 = sshll.u32 %s4269_s30, 3 }
 0x620   : > { %v1124_v37 = vpop.xlane.xlu1 %1123 }
 0x621   : > { %3531 = vrcp.f32 %v1124_v37 }
 0x624   : > { %v1118_v39 = vpop.xlane.xlu1 %1117 }
 0x625   : > { %3533 = vrcp.f32 %v1118_v39 }
 0x628   : > { %v1290_v38 = vpop.xlane.xlu0 %1289  ;;  %v1300_v44 = vpop.permute.xlu1 %1299 }
 0x62b   : > { %v3532_v45 = vpop.eup %3531 }
 0x62c   : > { %v1284_v41 = vpop.xlane.xlu0 %1283  ;;  %v1130_v49 = vmul.f32 %v3532_v45, %v3520_v22 }
 0x62e   : > { %v1132_v53 = vpack.c.bf16 %v1130_v49, %v1130_v49 }
 0x62f   : > { %v3534_v48 = vpop.eup %3533 }
 0x630   : > { %v1121_v20 = vpop.xlane.xlu0 %1120  ;;  %v1126_v50 = vmul.f32 %v3534_v48, %v3522_v25 }
 0x631   : > { %3535 = vrcp.f32 %v1121_v20 }
 0x632   : > { %3537 = vrcp.f32 %v1290_v38 }
 0x633   : > { %3539 = vrcp.f32 %v1284_v41 }
 0x634   : > { %v1136_v42 = vpop.permute.xlu0 %1135 }
 0x635   : > { %v1146_v43 = vsel %vm1144_vm10, %v1136_v42, 0  ;;  %3439 = vmatprep.subr.msk.bf16.mxu1 %vm1144_vm10, %v1136_v42 }
 0x636   : > { %3258 = vmatpush3.bf16.msra.mxu1 %v1146_v43 }
 0x637   : > { %3271 = vmatprep.subr.bf16.mxu1 %v1300_v44 }
 0x63b   : > { %v3536_v16 = vpop.eup %3535 }
 0x63c   : > { %v1128_v51 = vmul.f32 %v3536_v16, %v3528_v31  ;;  %v3538_v57 = vpop.eup %3537 }
 0x63d   : > { %v3540_v58 = vpop.eup %3539  ;;  %v1296_v60 = vmul.f32 %v3538_v57, %v3524_v27  ;;  %v3490_v57 = vld [vmem:[%s4230_s13 + $0x8] sm:$0xff]  }
 0x63e   : > { %v1131_v52 = vpack.c.bf16 %v1128_v51, %v1126_v50  ;;  %v1292_v61 = vmul.f32 %v3540_v58, %v3526_v29  ;;  %v3029_v29 = vld [vmem:[%s4227_s10] ss:$0 sm:$0xff] }
 0x63f   : > { %v1298_v0 = vpack.c.bf16 %v1296_v60, %v1296_v60 }
 0x640   : > { %3259 = vmatprep.mubr.msk.bf16.mxu1 %vm1097_vm9, %v1131_v52 }
 0x641   : > { %3260 = vmatmul.mubr.msk.bf16.vlgmr.msra.gmra.mrb[8].mxu1 %vm1097_vm9, %v1132_v53 }
 0x642   : > { %3272 = vmatpush3.bf16.msra.mxu1 %v1300_v44 }
 0x659   : > { %v1287_v54 = vpop.xlane.xlu1 %1286 }
 0x65a   : > { %3541 = vrcp.f32 %v1287_v54 }
 0x65d   : > { %v1302_v55 = vpop.permute.xlu1 %1301 }
 0x65e   : > { %v1311_v56 = vsel %vm1144_vm10, %v1302_v55, 0  ;;  %3442 = vmatprep.subr.msk.bf16.mxu1 %vm1144_vm10, %v1302_v55 }
 0x65f   : > { %3274 = vmatpush3.bf16.msra.mxu1 %v1311_v56  ;;  %v3489_v56 = vld [vmem:[%s4230_s13] sm:$0xff]  }
 0x660   : > { %3279 = vmatprep.subr.bf16.mxu1 %v3487_v10  ;;  %3287 = vmatprep.subr.bf16.mxu0 %v3489_v56 }
 0x661   : > { %3288 = vmatpush3.bf16.msra.mxu0 %v3489_v56 }
 0x662   : > { %3289 = vmatprep.subr.bf16.mxu0 %v3490_v57 }
 0x664   : > { %v3542_v59 = vpop.eup %3541 }
 0x665   : > { %v1294_v62 = vmul.f32 %v3542_v59, %v3530_v35  ;;  %3290 = vmatpush3.bf16.msra.mxu0 %v3490_v57 }
 0x667   : > { %v1297_v63 = vpack.c.bf16 %v1294_v62, %v1292_v61 }
 0x669   : > { %3275 = vmatprep.mubr.msk.bf16.mxu1 %vm1097_vm9, %v1297_v63 }
 0x66a   : > { %3276 = vmatmul.mubr.msk.bf16.vlgmr.msra.gmra.mrb[12].mxu1 %vm1097_vm9, %v1298_v0 }
 0x66b   : > { %3280 = vmatpush3.bf16.msra.mxu1 %v3487_v10 }
 0x66c   : > { %3281 = vmatprep.subr.bf16.mxu1 %v3488_v11 }
 0x66f   : > { %3282 = vmatpush3.bf16.msra.mxu1 %v3488_v11 }
 0x714   : > { %v3261_v1 = vpop.f32.mrb[8].mxu1 }
 0x715   : > { %v1182_v4 = vpop.f32.mrb[9].mxu1 }
 0x716   : > { %v3262_v5 = vpop.f32.mrb[10].mxu1 }
 0x717   : > { %v1185_v7 = vpop.f32.mrb[11].mxu1 }
 0x73d   : > { %v3277_v13 = vpop.f32.mrb[12].mxu1 }
 0x73e   : > { %1368 = vrot.lane.b32.xlu1 %v3277_v13, %s4243_s6  ;;  %v1347_v14 = vpop.f32.mrb[13].mxu1 }
 0x73f   : > { %v3278_v15 = vpop.f32.mrb[14].mxu1 }
 0x740   : > { %v1350_v17 = vpop.f32.mrb[15].mxu1 }
 0x741   : > { %v3471_v18 = vpack.i.bf16 %v1350_v17, %v1347_v14  ;;  %v3035_v17 = vld [vmem:[%s4229_s12] ss:$0 sm:$0xff] }
 0x743   : > { %3472 = vrot.lane.b32.xlu0 %v3471_v18, %s4243_s6  ;;  %s742_s6 = scalar_lea.vmem %s4240_s23, %s3003_s0 }
 0x7b0   : > { %v1369_v19 = vpop.permute.xlu1 %1368 }
 0x7b1   : > { %v1375_v24 = vsel %vm1036_vm5, %v3261_v1, %v1369_v19 }
 0x7b2   : > { %v1377_v28 = vpack.c.bf16 %v1375_v24, %v1375_v24 }
 0x7b5   : > { %v3473_v21 = vpop.permute.xlu0 %3472 }
 0x7b6   : > { %v3475_v22 = vunpack.i.h.bf16 %v3473_v21  ;;  %v3474_v23 = vunpack.i.l.bf16 %v3473_v21 }
 0x7b8   : > { %v1374_v25 = vsel %vm1036_vm5, %v1185_v7, %v3475_v22  ;;  %v1373_v26 = vsel %vm1036_vm5, %v1182_v4, %v3474_v23  ;;  %v3034_v7 = vld [vmem:[%s4228_s11] ss:$0 sm:$0xff] }
 0x7b9   : > { %v1376_v27 = vpack.c.bf16 %v1374_v25, %v1373_v26 }
 0x7bb   : > { %3283 = vmatprep.mubr.msk.bf16.mxu1 %vm859_vm4, %v1376_v27  ;;  %v3491_v27 = vld [vmem:[%s4232_s15] sm:$0xff]  }
 0x7bc   : > { %3284 = vmatmul.mubr.msk.bf16.vlgmr.msra.gmra.mrb[16].mxu1 %vm859_vm4, %v1377_v28  ;;  %3295 = vmatprep.subr.bf16.mxu1 %v3491_v27  ;;  %v3492_v28 = vld [vmem:[%s4232_s15 + $0x8] sm:$0xff]  }
 0x7bd   : > { %3296 = vmatpush3.bf16.msra.mxu1 %v3491_v27 }
 0x7be   : > { %3297 = vmatprep.subr.bf16.mxu1 %v3492_v28 }
 0x7c1   : > { %3298 = vmatpush3.bf16.msra.mxu1 %v3492_v28 }
 0x88f   : > { %v3285_v30 = vpop.f32.mrb[16].mxu1 }
 0x890   : > { %v1441_v31 = vpop.f32.mrb[17].mxu1  ;;  %v1450_v32 = vadd.f32 %v3285_v30, %v3029_v29  ;;  %v3494_v30 = vld [vmem:[%s4232_s15 + $0x18] sm:$0xff]  }
 0x891   : > { %v1442_v33 = vadd.f32 %v3029_v29, %v1441_v31  ;;  %v3286_v34 = vpop.f32.mrb[18].mxu1  ;;  %v3495_v31 = vld [vmem:[%s4232_s15 + $0x20] sm:$0xff]  }
 0x892   : > { %v1444_v35 = vpop.f32.mrb[19].mxu1  ;;  %v1457_v41 = vadd.f32 %v1450_v32, %v3806_v6  ;;  %v3496_v32 = vld [vmem:[%s4232_s15 + $0x28] sm:$0xff]   ;;  %v3498_v34 = vld [vmem:[%s4232_s15 + $0x38] sm:$0xff]  }
 0x893   : > { %v1445_v36 = vadd.f32 %v3029_v29, %v1444_v35  ;;  %v1455_v37 = vadd.f32 %v1442_v33, %v3800_v2  ;;  %v3493_v29 = vld [vmem:[%s4232_s15 + $0x10] sm:$0xff]   ;;  %v3036_v35 = vld [vmem:[%s4231_s14] ss:$0 sm:$0xff] }
 0x894   : > { %v1466_v42 = vsel %vm859_vm4, %v1457_v41, 0.0  ;;  %3299 = vmatprep.subr.bf16.mxu1 %v3493_v29  ;;  %v3497_v33 = vld [vmem:[%s4232_s15 + $0x30] sm:$0xff]  }
 0x895   : > { %v1460_v38 = vsel %vm859_vm4, %v1455_v37, 0.0  ;;  %v1456_v39 = vadd.f32 %v1445_v36, %v3802_v3  ;;  %3300 = vmatpush3.bf16.msra.mxu1 %v3493_v29 }
 0x896   : > { %1461 = vadd.xlane.f32.xlu0 %v1460_v38  ;;  %3301 = vmatprep.subr.bf16.mxu1 %v3494_v30 }
 0x897   : > { %v1463_v20 = vsel %vm859_vm4, %v1456_v39, 0.0 }
 0x898   : > { %1464 = vadd.xlane.f32.xlu1 %v1463_v20 }
 0x899   : > { %3302 = vmatpush3.bf16.msra.mxu1 %v3494_v30 }
 0x89a   : > { %1467 = vadd.xlane.f32.xlu0 %v1466_v42  ;;  %3303 = vmatprep.subr.bf16.mxu1 %v3495_v31 }
 0x89d   : > { %3304 = vmatpush3.bf16.msra.mxu1 %v3495_v31 }
 0x89e   : > { %3305 = vmatprep.subr.bf16.mxu1 %v3496_v32 }
 0x8a1   : > { %3306 = vmatpush3.bf16.msra.mxu1 %v3496_v32 }
 0x8a2   : > { %3307 = vmatprep.subr.bf16.mxu1 %v3497_v33 }
 0x8a5   : > { %3308 = vmatpush3.bf16.msra.mxu1 %v3497_v33 }
 0x8a6   : > { %3309 = vmatprep.subr.bf16.mxu1 %v3498_v34 }
 0x8a9   : > { %3310 = vmatpush3.bf16.msra.mxu1 %v3498_v34 }
 0x923   : > { %v1462_v43 = vpop.xlane.xlu0 %1461 }
 0x924   : > { %v1469_v44 = vmul.f32 0.03125, %v1462_v43 }
 0x925   : > { %v1465_v45 = vpop.xlane.xlu1 %1464 }
 0x926   : > { %v1472_v48 = vsub.f32 %v1455_v37, %v1469_v44  ;;  %v1470_v16 = vmul.f32 0.03125, %v1465_v45 }
 0x927   : > { %v1468_v49 = vpop.xlane.xlu0 %1467 }
 0x928   : > { %v1473_v2 = vsub.f32 %v1456_v39, %v1470_v16  ;;  %v1471_v50 = vmul.f32 0.03125, %v1468_v49  ;;  %v1475_v51 = vmul.f32 %v1472_v48, %v1472_v48 }
 0x92a   : > { %v1474_v52 = vsub.f32 %v1457_v41, %v1471_v50  ;;  %v1478_v3 = vsel %vm859_vm4, %v1475_v51, 0.0  ;;  %v1476_v6 = vmul.f32 %v1473_v2, %v1473_v2 }
 0x92b   : > { %1479 = vadd.xlane.f32.xlu0 %v1478_v3 }
 0x92c   : > { %v1481_v53 = vsel %vm859_vm4, %v1476_v6, 0.0  ;;  %v1477_v54 = vmul.f32 %v1474_v52, %v1474_v52 }
 0x92d   : > { %1482 = vadd.xlane.f32.xlu1 %v1481_v53 }
 0x92e   : > { %v1484_v55 = vsel %vm859_vm4, %v1477_v54, 0.0 }
 0x92f   : > { %1485 = vadd.xlane.f32.xlu0 %v1484_v55 }
 0x9b8   : > { %v1480_v58 = vpop.xlane.xlu0 %1479 }
 0x9b9   : > { %v1487_v59 = vmul.f32 0.03125, %v1480_v58 }
 0x9ba   : > { %v1483_v60 = vpop.xlane.xlu1 %1482 }
 0x9bb   : > { %v1490_v61 = vadd.f32 1e-12, %v1487_v59  ;;  %v1488_v62 = vmul.f32 0.03125, %v1483_v60 }
 0x9bc   : > { %v1486_v63 = vpop.xlane.xlu0 %1485 }
 0x9bd   : > { %3543 = vrsqrt.f32 %v1490_v61  ;;  %v1491_v0 = vadd.f32 1e-12, %v1488_v62  ;;  %v1489_v1 = vmul.f32 0.03125, %v1486_v63 }
 0x9bf   : > { %3545 = vrsqrt.f32 %v1491_v0  ;;  %v1492_v4 = vadd.f32 1e-12, %v1489_v1 }
 0x9c1   : > { %3547 = vrsqrt.f32 %v1492_v4 }
 0x9c7   : > { %v3544_v5 = vpop.eup %3543 }
 0x9c8   : > { %v1496_v10 = vmul.f32 %v3544_v5, %v1472_v48 }
 0x9c9   : > { %v3546_v11 = vpop.eup %3545 }
 0x9ca   : > { %v1497_v13 = vmul.f32 %v3546_v11, %v1473_v2  ;;  %v1505_v14 = vmul.f32 %v3034_v7, %v1496_v10  ;;  %v3041_v11 = vld [vmem:[%s4233_s16] ss:$0 sm:$0xff] }
 0x9cb   : > { %v3548_v15 = vpop.eup %3547 }
 0x9cc   : > { %v1498_v18 = vmul.f32 %v3548_v15, %v1474_v52  ;;  %v1506_v19 = vmul.f32 %v3034_v7, %v1497_v13  ;;  %v3931_v21 = vadd.f32 %v3035_v17, %v1505_v14 }
 0x9ce   : > { %v3933_v22 = vadd.f32 %v3035_v17, %v1506_v19  ;;  %v1507_v23 = vmul.f32 %v3034_v7, %v1498_v18 }
 0x9d0   : > { %v1517_v24 = vpack.c.bf16 %v3933_v22, %v3931_v21  ;;  %v3937_v25 = vadd.f32 %v3035_v17, %v1507_v23 }
 0x9d2   : > { %3291 = vmatprep.mubr.msk.bf16.mxu0 %vm859_vm4, %v1517_v24  ;;  %v1518_v26 = vpack.c.bf16 %v3937_v25, %v3937_v25 }
 0x9d4   : > { %3292 = vmatmul.mubr.msk.bf16.vlgmr.msra.gmra.mrb[8].mxu0 %vm859_vm4, %v1518_v26 }
 0xaa7   : > { %v3293_v36 = vpop.f32.mrb[8].mxu0 }
 0xaa8   : > { %v1591_v37 = vadd.f32 %v3293_v36, %v3036_v35  ;;  %v1582_v38 = vpop.f32.mrb[9].mxu0 }
 0xaa9   : > { %v1583_v39 = vadd.f32 %v3036_v35, %v1582_v38  ;;  %v3294_v41 = vpop.f32.mrb[10].mxu0 }
 0xaaa   : > { %v1598_v20 = vmul.f32 %v1591_v37, %v1591_v37  ;;  %v1585_v42 = vpop.f32.mrb[11].mxu0 }
 0xaab   : > { %v1596_v43 = vmul.f32 %v1583_v39, %v1583_v39  ;;  %v1586_v44 = vadd.f32 %v3036_v35, %v1585_v42 }
 0xaac   : > { %v1601_v45 = vmul.f32 %v1598_v20, %v1591_v37 }
 0xaad   : > { %v1599_v48 = vmul.f32 %v1596_v43, %v1583_v39  ;;  %v1597_v16 = vmul.f32 %v1586_v44, %v1586_v44  ;;  %v3499_v43 = vld [vmem:[%s4260_s7 + $0x10] sm:$0xff]  }
 0xaae   : > { %v1604_v49 = vmul.f32 0.044715, %v1601_v45  ;;  %3315 = vmatprep.subr.bf16.mxu0 %v3499_v43 }
 0xaaf   : > { %v1602_v2 = vmul.f32 0.044715, %v1599_v48  ;;  %v1600_v50 = vmul.f32 %v1597_v16, %v1586_v44  ;;  %3316 = vmatpush3.bf16.msra.mxu0 %v3499_v43 }
 0xab0   : > { %v1607_v51 = vadd.f32 %v1604_v49, %v1591_v37 }
 0xab1   : > { %v1605_v52 = vadd.f32 %v1602_v2, %v1583_v39  ;;  %v1603_v3 = vmul.f32 0.044715, %v1600_v50 }
 0xab2   : > { %v1610_v6 = vmul.f32 0.7978846, %v1607_v51 }
 0xab3   : > { %v1608_v53 = vmul.f32 0.7978846, %v1605_v52  ;;  %v1606_v54 = vadd.f32 %v1603_v3, %v1586_v44 }
 0xab4   : > { %3549 = vtanh.f32 %v1610_v6 }
 0xab5   : > { %3551 = vtanh.f32 %v1608_v53  ;;  %v1609_v55 = vmul.f32 0.7978846, %v1606_v54  ;;  %v3050_v53 = vld [vmem:[%s4234_s17] ss:$0 sm:$0xff] }
 0xab7   : > { %3553 = vtanh.f32 %v1609_v55 }
 0xabe   : > { %v3550_v56 = vpop.eup %3549 }
 0xabf   : > { %v3552_v57 = vpop.eup %3551  ;;  %v1616_v58 = vadd.f32 1.0, %v3550_v56 }
 0xac0   : > { %v1614_v59 = vadd.f32 1.0, %v3552_v57 }
 0xac1   : > { %v3554_v60 = vpop.eup %3553  ;;  %v1619_v61 = vmul.f32 0.5, %v1616_v58 }
 0xac2   : > { %v1615_v62 = vadd.f32 1.0, %v3554_v60  ;;  %v1617_v63 = vmul.f32 0.5, %v1614_v59  ;;  %v3051_v59 = vld [vmem:[%s4235_s18] ss:$0 sm:$0xff] }
 0xac3   : > { %v1622_v1 = vmul.f32 %v1619_v61, %v1591_v37 }
 0xac4   : > { %v1618_v0 = vmul.f32 0.5, %v1615_v62  ;;  %v1620_v4 = vmul.f32 %v1617_v63, %v1583_v39 }
 0xac5   : > { %v1624_v10 = vpack.c.bf16 %v1622_v1, %v1622_v1 }
 0xac6   : > { %v1621_v5 = vmul.f32 %v1618_v0, %v1586_v44  ;;  %v3500_v44 = vld [vmem:[%s4260_s7 + $0x18] sm:$0xff]  }
 0xac7   : > { %3317 = vmatprep.subr.bf16.mxu0 %v3500_v44 }
 0xac8   : > { %v1623_v7 = vpack.c.bf16 %v1621_v5, %v1620_v4  ;;  %3318 = vmatpush3.bf16.msra.mxu0 %v3500_v44 }
 0xaca   : > { %3311 = vmatprep.mubr.bf16.mxu1 %v1623_v7  ;;  %v3057_v7 = vld [vmem:[%s4225_s8 + $0x1] ss:$0 sm:$0xff] }
 0xacb   : > { %3312 = vmatmul.mubr.bf16.vlgmr.msra.gmra.mrb[20].mxu1 %v1624_v10 }
 0xb9e   : > { %v3313_v13 = vpop.f32.mrb[20].mxu1 }
 0xb9f   : > { %v1730_v14 = vpop.f32.mrb[21].mxu1  ;;  %v1739_v15 = vadd.f32 %v3313_v13, %v3041_v11 }
 0xba0   : > { %v1731_v17 = vadd.f32 %v3041_v11, %v1730_v14  ;;  %v3314_v18 = vpop.f32.mrb[22].mxu1 }
 0xba1   : > { %v1733_v19 = vpop.f32.mrb[23].mxu1  ;;  %v1746_v28 = vadd.f32 %v1739_v15, %v3937_v25 }
 0xba2   : > { %v1734_v23 = vadd.f32 %v3041_v11, %v1733_v19  ;;  %v1744_v24 = vadd.f32 %v1731_v17, %v3931_v21 }
 0xba3   : > { %v1755_v30 = vsel %vm859_vm4, %v1746_v28, 0.0 }
 0xba4   : > { %v1749_v26 = vsel %vm859_vm4, %v1744_v24, 0.0  ;;  %v1745_v27 = vadd.f32 %v1734_v23, %v3933_v22 }
 0xba5   : > { %1750 = vadd.xlane.f32.xlu1 %v1749_v26 }
 0xba6   : > { %v1752_v29 = vsel %vm859_vm4, %v1745_v27, 0.0 }
 0xba7   : > { %1753 = vadd.xlane.f32.xlu0 %v1752_v29 }
 0xba9   : > { %1756 = vadd.xlane.f32.xlu1 %v1755_v30 }
 0xc32   : > { %v1751_v31 = vpop.xlane.xlu1 %1750 }
 0xc33   : > { %v1758_v32 = vmul.f32 0.03125, %v1751_v31 }
 0xc34   : > { %v1754_v33 = vpop.xlane.xlu0 %1753 }
 0xc35   : > { %v1761_v34 = vsub.f32 %v1744_v24, %v1758_v32  ;;  %v1759_v35 = vmul.f32 0.03125, %v1754_v33 }
 0xc36   : > { %v1757_v36 = vpop.xlane.xlu1 %1756 }
 0xc37   : > { %v1762_v21 = vsub.f32 %v1745_v27, %v1759_v35  ;;  %v1760_v37 = vmul.f32 0.03125, %v1757_v36  ;;  %v1764_v38 = vmul.f32 %v1761_v34, %v1761_v34 }
 0xc39   : > { %v1763_v39 = vsub.f32 %v1746_v28, %v1760_v37  ;;  %v1767_v22 = vsel %vm859_vm4, %v1764_v38, 0.0  ;;  %v1765_v25 = vmul.f32 %v1762_v21, %v1762_v21 }
 0xc3a   : > { %1768 = vadd.xlane.f32.xlu0 %v1767_v22 }
 0xc3b   : > { %v1770_v41 = vsel %vm859_vm4, %v1765_v25, 0.0  ;;  %v1766_v20 = vmul.f32 %v1763_v39, %v1763_v39 }
 0xc3c   : > { %1771 = vadd.xlane.f32.xlu1 %v1770_v41 }
 0xc3d   : > { %v1773_v42 = vsel %vm859_vm4, %v1766_v20, 0.0 }
 0xc3e   : > { %1774 = vadd.xlane.f32.xlu0 %v1773_v42 }
 0xcc7   : > { %v1769_v45 = vpop.xlane.xlu0 %1768 }
 0xcc8   : > { %v1776_v48 = vmul.f32 0.03125, %v1769_v45 }
 0xcc9   : > { %v1772_v16 = vpop.xlane.xlu1 %1771 }
 0xcca   : > { %v1779_v49 = vadd.f32 1e-12, %v1776_v48  ;;  %v1777_v2 = vmul.f32 0.03125, %v1772_v16 }
 0xccb   : > { %v1775_v50 = vpop.xlane.xlu0 %1774 }
 0xccc   : > { %3555 = vrsqrt.f32 %v1779_v49  ;;  %v1780_v51 = vadd.f32 1e-12, %v1777_v2  ;;  %v1778_v52 = vmul.f32 0.03125, %v1775_v50 }
 0xcce   : > { %3557 = vrsqrt.f32 %v1780_v51  ;;  %v1781_v3 = vadd.f32 1e-12, %v1778_v52 }
 0xcd0   : > { %3559 = vrsqrt.f32 %v1781_v3 }
 0xcd6   : > { %v3556_v6 = vpop.eup %3555 }
 0xcd7   : > { %v1785_v54 = vmul.f32 %v3556_v6, %v1761_v34 }
 0xcd8   : > { %v3558_v55 = vpop.eup %3557 }
 0xcd9   : > { %v1786_v56 = vmul.f32 %v3558_v55, %v1762_v21  ;;  %v1794_v57 = vmul.f32 %v3050_v53, %v1785_v54 }
 0xcda   : > { %v3560_v58 = vpop.eup %3559 }
 0xcdb   : > { %v1787_v60 = vmul.f32 %v3560_v58, %v1763_v39  ;;  %v1795_v61 = vmul.f32 %v3050_v53, %v1786_v56  ;;  %v3994_v62 = vadd.f32 %v3051_v59, %v1794_v57 }
 0xcdd   : > { %v3996_v63 = vadd.f32 %v3051_v59, %v1795_v61  ;;  %v1796_v0 = vmul.f32 %v3050_v53, %v1787_v60 }
 0xcdf   : > { %v1806_v1 = vpack.c.bf16 %v3996_v63, %v3994_v62  ;;  %v4000_v4 = vadd.f32 %v3051_v59, %v1796_v0 }
 0xce1   : > { %3319 = vmatprep.mubr.msk.bf16.mxu0 %vm859_vm4, %v1806_v1  ;;  %v1807_v5 = vpack.c.bf16 %v4000_v4, %v4000_v4 }
 0xce3   : > { %3320 = vmatmul.mubr.msk.bf16.vlgmr.msra.gmra.mrb[12].mxu0 %vm859_vm4, %v1807_v5 }
 0xdb6   : > { %v3321_v10 = vpop.f32.mrb[12].mxu0 }
 0xdb7   : > { %v1882_v11 = vadd.f32 %v3321_v10, %v3057_v7  ;;  %v1873_v13 = vpop.f32.mrb[13].mxu0 }
 0xdb8   : > { %v3322_v14 = vpop.f32.mrb[14].mxu0  ;;  %v1874_v18 = vadd.f32 %v3057_v7, %v1873_v13 }
 0xdb9   : > { %v4009_v15 = vpack.c.bf16 %v1882_v11, %v1882_v11  ;;  %v1876_v17 = vpop.f32.mrb[15].mxu0 }
 0xdba   : > { %v1877_v19 = vadd.f32 %v3057_v7, %v1876_v17 }
 0xdbb   : > { %1893 = vrot.lane.b32.xlu0 %v4009_v15, %s3613_s28 }
 0xdbc   : > { %v4013_v23 = vpack.c.bf16 %v1877_v19, %v1874_v18 }
 0xdbe   : > { %1891 = vrot.lane.b32.xlu1 %v4013_v23, %s3613_s28  ;;  %3327 = vmatprep.mubr.msk.bf16.mxu0 %vm1036_vm5, %v4013_v23  ;;  %s4265_s28 = smov 64  }
 0xdbf   : > { %2052 = vrot.lane.b32.xlu0 %v4013_v23, %s3615_s1 }
 0xdc2   : > { %2056 = vrot.lane.b32.xlu1 %v4013_v23, %s3614_s29 }
 0xdc6   : > { %2058 = vrot.lane.b32.xlu1 %v4009_v15, %s3614_s29  ;;  %s4266_s29 = smov 48  }
 0xdca   : > { %2054 = vrot.lane.b32.xlu1 %v4009_v15, %s3615_s1 }
 0xe2d   : > { %v1894_v24 = vpop.permute.xlu0 %1893 }
 0xe2e   : > { %v1905_v32 = vsel %vm1036_vm5, %v1894_v24, 0 }
 0xe30   : > { %v1892_v26 = vpop.permute.xlu1 %1891 }
 0xe31   : > { %v1902_v27 = vsel %vm1036_vm5, %v1892_v26, 0  ;;  %v2053_v28 = vpop.permute.xlu0 %2052  ;;  %3443 = vmatprep.subr.msk.bf16.mxu0 %vm1036_vm5, %v1892_v26 }
 0xe32   : > { %3324 = vmatpush3.bf16.xpose.msra.mxu0 %v1902_v27  ;;  %3343 = vmatprep.mubr.msk.bf16.mxu1 %vm1036_vm5, %v2053_v28 }
 0xe33   : > { %3444 = vmatprep.subr.msk.bf16.mxu0 %vm1036_vm5, %v1894_v24 }
 0xe34   : > { %v2057_v29 = vpop.permute.xlu1 %2056 }
 0xe35   : > { %v2067_v30 = vsel %vm1036_vm5, %v2057_v29, 0  ;;  %3446 = vmatprep.subr.msk.bf16.mxu1 %vm1036_vm5, %v2057_v29 }
 0xe36   : > { %3340 = vmatpush3.bf16.xpose.msra.mxu1 %v2067_v30 }
 0xe38   : > { %v2059_v31 = vpop.permute.xlu1 %2058 }
 0xe39   : > { %3447 = vmatprep.subr.msk.bf16.mxu1 %vm1036_vm5, %v2059_v31  ;;  %v2070_v33 = vsel %vm1036_vm5, %v2059_v31, 0 }
 0xe3a   : > { %3326 = vmatpush3.bf16.xpose.msra.mxu0 %v1905_v32 }
 0xe3c   : > { %v2055_v34 = vpop.permute.xlu1 %2054 }
 0xe3e   : > { %3342 = vmatpush3.bf16.xpose.msra.mxu1 %v2070_v33 }
 0xe41   : > { %3328 = vmatmul.mubr.msk.bf16.vlgmr.msra.gmra.mrb[16].mxu0 %vm1036_vm5, %v4009_v15 }
 0xe45   : > { %3344 = vmatmul.mubr.msk.bf16.vlgmr.msra.gmra.mrb[24].mxu1 %vm1036_vm5, %v2055_v34 }
 0xf14   : > { %v3329_v35 = vpop.f32.mrb[16].mxu0 }
 0xf15   : > { %v1941_v36 = vpop.f32.mrb[17].mxu0  ;;  %v1950_v39 = vadd.f32 %v3329_v35, %v3859_v47 }
 0xf16   : > { %v1942_v21 = vadd.f32 %v1941_v36, %v3854_v40  ;;  %v3330_v37 = vpop.f32.mrb[18].mxu0 }
 0xf17   : > { %v1944_v38 = vpop.f32.mrb[19].mxu0  ;;  %v1961_v16 = vsel %vm1097_vm9, %v1950_v39, -inf }
 0xf18   : > { %v1945_v22 = vadd.f32 %v1944_v38, %v3857_v46  ;;  %v3345_v25 = vpop.f32.mrb[24].mxu1  ;;  %v1955_v41 = vsel %vm1097_vm9, %v1942_v21, -inf }
 0xf19   : > { %v2106_v20 = vpop.f32.mrb[25].mxu1  ;;  %1956 = vmax.xlane.f32.xlu0 %v1955_v41  ;;  %v2115_v2 = vadd.f32 %v3345_v25, %v3859_v47 }
 0xf1a   : > { %v3346_v42 = vpop.f32.mrb[26].mxu1  ;;  %v1958_v43 = vsel %vm1097_vm9, %v1945_v22, -inf  ;;  %v2107_v45 = vadd.f32 %v2106_v20, %v3854_v40 }
 0xf1b   : > { %v2109_v44 = vpop.f32.mrb[27].mxu1  ;;  %1959 = vmax.xlane.f32.xlu1 %v1958_v43  ;;  %v2126_v51 = vsel %vm1097_vm9, %v2115_v2, -inf }
 0xf1c   : > { %v2110_v48 = vadd.f32 %v2109_v44, %v3857_v46  ;;  %v2120_v50 = vsel %vm1097_vm9, %v2107_v45, -inf }
 0xf1d   : > { %1962 = vmax.xlane.f32.xlu0 %v1961_v16 }
 0xf1e   : > { %v2123_v49 = vsel %vm1097_vm9, %v2110_v48, -inf }
 0xf1f   : > { %2124 = vmax.xlane.f32.xlu1 %v2123_v49 }
 0xf21   : > { %2121 = vmax.xlane.f32.xlu0 %v2120_v50 }
 0xf25   : > { %2127 = vmax.xlane.f32.xlu0 %v2126_v51 }
 0xf30   : > { %1990 = vrot.lane.b32.xlu1 %v4013_v23, %s4265_s28 }
 0xfa6   : > { %v1957_v40 = vpop.xlane.xlu0 %1956 }
 0xfa7   : > { %v1964_v46 = vsub.f32 %v1942_v21, %v1957_v40 }
 0xfa8   : > { %v1960_v52 = vpop.xlane.xlu1 %1959 }
 0xfa9   : > { %v1967_v54 = vmul.f32 1.442695, %v1964_v46  ;;  %v1965_v60 = vsub.f32 %v1945_v22, %v1960_v52 }
 0xfaa   : > { %v1963_v3 = vpop.xlane.xlu0 %1962 }
 0xfab   : > { %v1966_v6 = vsub.f32 %v1950_v39, %v1963_v3  ;;  %v1969_v5 = vmul.f32 1.442695, %v1965_v60 }
 0xfac   : > { %v2125_v53 = vpop.xlane.xlu1 %2124 }
 0xfad   : > { %v1971_v55 = vmul.f32 1.442695, %v1966_v6  ;;  %v2130_v26 = vsub.f32 %v2110_v48, %v2125_v53  ;;  %v3501_v6 = vld [vmem:[%s4226_s9 + $0x10] sm:$0xff]   ;;  %v3502_v53 = vld [vmem:[%s4226_s9 + $0x18] sm:$0xff]  }
 0xfae   : > { %v2122_v56 = vpop.xlane.xlu0 %2121 }
 0xfaf   : > { %3561 = vpow2.f32 %v1971_v55  ;;  %v2129_v57 = vsub.f32 %v2107_v45, %v2122_v56  ;;  %v2134_v27 = vmul.f32 1.442695, %v2130_v26 }
 0xfb0   : > { %v1991_v47 = vpop.permute.xlu1 %1990  ;;  %3563 = vpow2.f32 %v1967_v54 }
 0xfb1   : > { %3331 = vmatprep.subr.bf16.mxu0 %v1991_v47  ;;  %v2132_v61 = vmul.f32 1.442695, %v2129_v57 }
 0xfb2   : > { %3332 = vmatpush3.bf16.msra.mxu0 %v1991_v47  ;;  %v2128_v58 = vpop.xlane.xlu0 %2127 }
 0xfb3   : > { %v2131_v59 = vsub.f32 %v2115_v2, %v2128_v58 }
 0xfb5   : > { %v2136_v0 = vmul.f32 1.442695, %v2131_v59 }
 0xfb7   : > { %3565 = vpow2.f32 %v2136_v0 }
 0xfb8   : > { %3567 = vpow2.f32 %v2132_v61 }
 0xfb9   : > { %v3562_v1 = vpop.eup %3561  ;;  %3569 = vpow2.f32 %v1969_v5 }
 0xfba   : > { %v1979_v7 = vsel %vm1097_vm9, %v3562_v1, 0.0  ;;  %v3564_v10 = vpop.eup %3563  ;;  %3571 = vpow2.f32 %v2134_v27 }
 0xfbb   : > { %1980 = vadd.xlane.f32.xlu1 %v1979_v7  ;;  %v1973_v11 = vsel %vm1097_vm9, %v3564_v10, 0.0 }
 0xfbf   : > { %1974 = vadd.xlane.f32.xlu1 %v1973_v11  ;;  %v3075_v11 = vld [vmem:[%s4227_s10 + $0x1] ss:$0 sm:$0xff] }
 0xfc1   : > { %v3566_v13 = vpop.eup %3565 }
 0xfc2   : > { %v2144_v14 = vsel %vm1097_vm9, %v3566_v13, 0.0  ;;  %v3568_v17 = vpop.eup %3567 }
 0xfc3   : > { %2145 = vadd.xlane.f32.xlu0 %v2144_v14  ;;  %v2138_v18 = vsel %vm1097_vm9, %v3568_v17, 0.0  ;;  %v3570_v19 = vpop.eup %3569 }
 0xfc4   : > { %v1976_v24 = vsel %vm1097_vm9, %v3570_v19, 0.0  ;;  %v3572_v28 = vpop.eup %3571 }
 0xfc5   : > { %v2141_v29 = vsel %vm1097_vm9, %v3572_v28, 0.0 }
 0xfc7   : > { %2139 = vadd.xlane.f32.xlu0 %v2138_v18 }
 0xfcb   : > { %1977 = vadd.xlane.f32.xlu0 %v1976_v24 }
 0xfd0   : > { %2155 = vrot.lane.b32.xlu1 %v4013_v23, %s4266_s29 }
 0xfe1   : > { %1992 = vrot.lane.b32.xlu0 %v4009_v15, %s4265_s28 }
 0xff4   : > { %2142 = vadd.xlane.f32.xlu1 %v2141_v29 }
0x1005   : > { %2157 = vrot.lane.b32.xlu1 %v4009_v15, %s4266_s29 }
0x1048   : > { %v1981_v30 = vpop.xlane.xlu1 %1980 }
0x1049   : > { %3573 = vrcp.f32 %v1981_v30 }
0x104c   : > { %v1975_v32 = vpop.xlane.xlu1 %1974 }
0x104d   : > { %3575 = vrcp.f32 %v1975_v32 }
0x1050   : > { %v2146_v31 = vpop.xlane.xlu0 %2145  ;;  %v2156_v36 = vpop.permute.xlu1 %2155 }
0x1053   : > { %v3574_v21 = vpop.eup %3573 }
0x1054   : > { %v2140_v33 = vpop.xlane.xlu0 %2139  ;;  %v1987_v15 = vmul.f32 %v3574_v21, %v3562_v1 }
0x1056   : > { %v1989_v41 = vpack.c.bf16 %v1987_v15, %v1987_v15 }
0x1057   : > { %v3576_v37 = vpop.eup %3575 }
0x1058   : > { %v1978_v23 = vpop.xlane.xlu0 %1977  ;;  %v1983_v39 = vmul.f32 %v3576_v37, %v3564_v10 }
0x1059   : > { %3577 = vrcp.f32 %v1978_v23 }
0x105a   : > { %3579 = vrcp.f32 %v2146_v31 }
0x105b   : > { %3581 = vrcp.f32 %v2140_v33 }
0x105c   : > { %v1993_v34 = vpop.permute.xlu0 %1992 }
0x105d   : > { %v2002_v35 = vsel %vm1144_vm10, %v1993_v34, 0  ;;  %3445 = vmatprep.subr.msk.bf16.mxu0 %vm1144_vm10, %v1993_v34 }
0x105e   : > { %3334 = vmatpush3.bf16.msra.mxu0 %v2002_v35 }
0x105f   : > { %3347 = vmatprep.subr.bf16.mxu0 %v2156_v36 }
0x1063   : > { %v3578_v38 = vpop.eup %3577 }
0x1064   : > { %v1985_v22 = vmul.f32 %v3578_v38, %v3570_v19  ;;  %v3580_v44 = vpop.eup %3579 }
0x1065   : > { %v3582_v45 = vpop.eup %3581  ;;  %v2152_v16 = vmul.f32 %v3580_v44, %v3566_v13 }
0x1066   : > { %v1988_v25 = vpack.c.bf16 %v1985_v22, %v1983_v39  ;;  %v2148_v49 = vmul.f32 %v3582_v45, %v3568_v17 }
0x1067   : > { %v2154_v51 = vpack.c.bf16 %v2152_v16, %v2152_v16 }
0x1068   : > { %3335 = vmatprep.mubr.msk.bf16.mxu0 %vm1097_vm9, %v1988_v25 }
0x1069   : > { %3336 = vmatmul.mubr.msk.bf16.vlgmr.msra.gmra.mrb[20].mxu0 %vm1097_vm9, %v1989_v41  ;;  %v3503_v41 = vld [vmem:[%s4230_s13 + $0x10] sm:$0xff]  }
0x106a   : > { %3348 = vmatpush3.bf16.msra.mxu0 %v2156_v36  ;;  %3363 = vmatprep.subr.bf16.mxu1 %v3503_v41 }
0x106b   : > { %3364 = vmatpush3.bf16.msra.mxu1 %v3503_v41 }
0x1081   : > { %v2143_v20 = vpop.xlane.xlu1 %2142 }
0x1082   : > { %3583 = vrcp.f32 %v2143_v20  ;;  %v3504_v20 = vld [vmem:[%s4230_s13 + $0x18] sm:$0xff]  }
0x1083   : > { %3365 = vmatprep.subr.bf16.mxu1 %v3504_v20 }
0x1084   : > { %3366 = vmatpush3.bf16.msra.mxu1 %v3504_v20 }
0x1085   : > { %v2158_v42 = vpop.permute.xlu1 %2157 }
0x1086   : > { %v2167_v43 = vsel %vm1144_vm10, %v2158_v42, 0  ;;  %3448 = vmatprep.subr.msk.bf16.mxu0 %vm1144_vm10, %v2158_v42 }
0x1087   : > { %3350 = vmatpush3.bf16.msra.mxu0 %v2167_v43 }
0x1088   : > { %3355 = vmatprep.subr.bf16.mxu0 %v3501_v6 }
0x108c   : > { %v3584_v48 = vpop.eup %3583 }
0x108d   : > { %v2150_v2 = vmul.f32 %v3584_v48, %v3572_v28 }
0x108f   : > { %v2153_v50 = vpack.c.bf16 %v2150_v2, %v2148_v49 }
0x1091   : > { %3351 = vmatprep.mubr.msk.bf16.mxu0 %vm1097_vm9, %v2153_v50 }
0x1092   : > { %3352 = vmatmul.mubr.msk.bf16.vlgmr.msra.gmra.mrb[24].mxu0 %vm1097_vm9, %v2154_v51 }
0x1093   : > { %3356 = vmatpush3.bf16.msra.mxu0 %v3501_v6 }
0x1094   : > { %3357 = vmatprep.subr.bf16.mxu0 %v3502_v53 }
0x1097   : > { %3358 = vmatpush3.bf16.msra.mxu0 %v3502_v53 }
0x113c   : > { %v3337_v40 = vpop.f32.mrb[20].mxu0 }
0x113d   : > { %v2038_v52 = vpop.f32.mrb[21].mxu0 }
0x113e   : > { %v3338_v46 = vpop.f32.mrb[22].mxu0 }
0x113f   : > { %v2041_v3 = vpop.f32.mrb[23].mxu0 }
0x1165   : > { %v3353_v54 = vpop.f32.mrb[24].mxu0 }
0x1166   : > { %2224 = vrot.lane.b32.xlu1 %v3353_v54, %s4267_s24  ;;  %v2203_v55 = vpop.f32.mrb[25].mxu0  ;;  %v3083_v54 = vld [vmem:[%s4229_s12 + $0x1] ss:$0 sm:$0xff] }
0x1167   : > { %v3354_v56 = vpop.f32.mrb[26].mxu0 }
0x1168   : > { %v2206_v47 = vpop.f32.mrb[27].mxu0 }
0x1169   : > { %v3476_v57 = vpack.i.bf16 %v2206_v47, %v2203_v55 }
0x116b   : > { %3477 = vrot.lane.b32.xlu0 %v3476_v57, %s4267_s24 }
0x11d8   : > { %v2225_v58 = vpop.permute.xlu1 %2224 }
0x11d9   : > { %v2231_v0 = vsel %vm1036_vm5, %v3337_v40, %v2225_v58  ;;  %v3082_v40 = vld [vmem:[%s4228_s11 + $0x1] ss:$0 sm:$0xff] }
0x11da   : > { %v2233_v10 = vpack.c.bf16 %v2231_v0, %v2231_v0  ;;  %v3505_v0 = vld [vmem:[%s4232_s15 + $0x40] sm:$0xff]  }
0x11db   : > { %3371 = vmatprep.subr.bf16.mxu0 %v3505_v0 }
0x11dd   : > { %v3478_v59 = vpop.permute.xlu0 %3477 }
0x11de   : > { %v3480_v60 = vunpack.i.h.bf16 %v3478_v59  ;;  %v3479_v61 = vunpack.i.l.bf16 %v3478_v59 }
0x11e0   : > { %v2230_v1 = vsel %vm1036_vm5, %v2041_v3, %v3480_v60  ;;  %v2229_v5 = vsel %vm1036_vm5, %v2038_v52, %v3479_v61 }
0x11e1   : > { %v2232_v7 = vpack.c.bf16 %v2230_v1, %v2229_v5  ;;  %v3506_v1 = vld [vmem:[%s4232_s15 + $0x48] sm:$0xff]   ;;  %v3507_v5 = vld [vmem:[%s4232_s15 + $0x50] sm:$0xff]  }
0x11e3   : > { %3359 = vmatprep.mubr.msk.bf16.mxu0 %vm859_vm4, %v2232_v7  ;;  %v3508_v7 = vld [vmem:[%s4232_s15 + $0x58] sm:$0xff]  }
0x11e4   : > { %3360 = vmatmul.mubr.msk.bf16.vlgmr.msra.gmra.mrb[28].mxu0 %vm859_vm4, %v2233_v10  ;;  %v3509_v10 = vld [vmem:[%s4232_s15 + $0x60] sm:$0xff]  }
0x11e5   : > { %3372 = vmatpush3.bf16.msra.mxu0 %v3505_v0 }
0x11e6   : > { %3373 = vmatprep.subr.bf16.mxu0 %v3506_v1 }
0x11e9   : > { %3374 = vmatpush3.bf16.msra.mxu0 %v3506_v1 }
0x11ea   : > { %3375 = vmatprep.subr.bf16.mxu0 %v3507_v5 }
0x11ed   : > { %3376 = vmatpush3.bf16.msra.mxu0 %v3507_v5 }
0x11ee   : > { %3377 = vmatprep.subr.bf16.mxu0 %v3508_v7 }
0x11f1   : > { %3378 = vmatpush3.bf16.msra.mxu0 %v3508_v7 }
0x11f2   : > { %3379 = vmatprep.subr.bf16.mxu0 %v3509_v10 }
0x11f5   : > { %3380 = vmatpush3.bf16.msra.mxu0 %v3509_v10 }
0x12b7   : > { %v3361_v13 = vpop.f32.mrb[28].mxu0 }
0x12b8   : > { %v2299_v14 = vpop.f32.mrb[29].mxu0  ;;  %v2308_v17 = vadd.f32 %v3361_v13, %v3075_v11  ;;  %v3511_v13 = vld [vmem:[%s4232_s15 + $0x70] sm:$0xff]  }
0x12b9   : > { %v2300_v18 = vadd.f32 %v3075_v11, %v2299_v14  ;;  %v3362_v19 = vpop.f32.mrb[30].mxu0  ;;  %v3512_v14 = vld [vmem:[%s4232_s15 + $0x78] sm:$0xff]  }
0x12ba   : > { %v2302_v24 = vpop.f32.mrb[31].mxu0  ;;  %v2315_v30 = vadd.f32 %v2308_v17, %v4000_v4  ;;  %v3089_v17 = vld [vmem:[%s4231_s14 + $0x1] ss:$0 sm:$0xff] }
0x12bb   : > { %v2303_v26 = vadd.f32 %v3075_v11, %v2302_v24  ;;  %v2313_v27 = vadd.f32 %v2300_v18, %v3994_v62  ;;  %v3510_v11 = vld [vmem:[%s4232_s15 + $0x68] sm:$0xff]  }
0x12bc   : > { %v2326_v32 = vsel %vm859_vm4, %v2315_v30, 0.0  ;;  %3381 = vmatprep.subr.bf16.mxu0 %v3510_v11 }
0x12bd   : > { %v2320_v28 = vsel %vm859_vm4, %v2313_v27, 0.0  ;;  %v2314_v29 = vadd.f32 %v2303_v26, %v3996_v63  ;;  %3382 = vmatpush3.bf16.msra.mxu0 %v3510_v11 }
0x12be   : > { %2321 = vadd.xlane.f32.xlu0 %v2320_v28  ;;  %3383 = vmatprep.subr.bf16.mxu0 %v3511_v13 }
0x12bf   : > { %v2323_v31 = vsel %vm859_vm4, %v2314_v29, 0.0 }
0x12c0   : > { %2324 = vadd.xlane.f32.xlu1 %v2323_v31 }
0x12c1   : > { %3384 = vmatpush3.bf16.msra.mxu0 %v3511_v13 }
0x12c2   : > { %2327 = vadd.xlane.f32.xlu0 %v2326_v32  ;;  %3385 = vmatprep.subr.bf16.mxu0 %v3512_v14 }
0x12c5   : > { %3386 = vmatpush3.bf16.msra.mxu0 %v3512_v14 }
0x134b   : > { %v2322_v33 = vpop.xlane.xlu0 %2321 }
0x134c   : > { %v2329_v23 = vmul.f32 0.03125, %v2322_v33 }
0x134d   : > { %v2325_v34 = vpop.xlane.xlu1 %2324 }
0x134e   : > { %v2332_v35 = vsub.f32 %v2313_v27, %v2329_v23  ;;  %v2330_v36 = vmul.f32 0.03125, %v2325_v34 }
0x134f   : > { %v2328_v21 = vpop.xlane.xlu0 %2327 }
0x1350   : > { %v2333_v62 = vsub.f32 %v2314_v29, %v2330_v36  ;;  %v2331_v37 = vmul.f32 0.03125, %v2328_v21  ;;  %v2335_v38 = vmul.f32 %v2332_v35, %v2332_v35 }
0x1352   : > { %v2334_v15 = vsub.f32 %v2315_v30, %v2331_v37  ;;  %v2338_v63 = vsel %vm859_vm4, %v2335_v38, 0.0  ;;  %v2336_v4 = vmul.f32 %v2333_v62, %v2333_v62 }
0x1353   : > { %2339 = vadd.xlane.f32.xlu0 %v2338_v63 }
0x1354   : > { %v2341_v39 = vsel %vm859_vm4, %v2336_v4, 0.0  ;;  %v2337_v22 = vmul.f32 %v2334_v15, %v2334_v15 }
0x1355   : > { %2342 = vadd.xlane.f32.xlu1 %v2341_v39 }
0x1356   : > { %v2344_v25 = vsel %vm859_vm4, %v2337_v22, 0.0 }
0x1357   : > { %2345 = vadd.xlane.f32.xlu0 %v2344_v25 }
0x13e0   : > { %v2340_v42 = vpop.xlane.xlu0 %2339 }
0x13e1   : > { %v2347_v43 = vmul.f32 0.03125, %v2340_v42 }
0x13e2   : > { %v2343_v44 = vpop.xlane.xlu1 %2342 }
0x13e3   : > { %v2350_v45 = vadd.f32 1e-12, %v2347_v43  ;;  %v2348_v48 = vmul.f32 0.03125, %v2343_v44 }
0x13e4   : > { %v2346_v16 = vpop.xlane.xlu0 %2345 }
0x13e5   : > { %3585 = vrsqrt.f32 %v2350_v45  ;;  %v2351_v49 = vadd.f32 1e-12, %v2348_v48  ;;  %v2349_v2 = vmul.f32 0.03125, %v2346_v16 }
0x13e7   : > { %3587 = vrsqrt.f32 %v2351_v49  ;;  %v2352_v50 = vadd.f32 1e-12, %v2349_v2 }
0x13e9   : > { %3589 = vrsqrt.f32 %v2352_v50 }
0x13ef   : > { %v3586_v51 = vpop.eup %3585 }
0x13f0   : > { %v2356_v52 = vmul.f32 %v3586_v51, %v2332_v35  ;;  %v3111_v51 = vld [vmem:[%s4233_s16 + $0x1] ss:$0 sm:$0xff] }
0x13f1   : > { %v3588_v46 = vpop.eup %3587 }
0x13f2   : > { %v2357_v3 = vmul.f32 %v3588_v46, %v2333_v62  ;;  %v2365_v6 = vmul.f32 %v3082_v40, %v2356_v52 }
0x13f3   : > { %v3590_v53 = vpop.eup %3589 }
0x13f4   : > { %v2358_v55 = vmul.f32 %v3590_v53, %v2334_v15  ;;  %v2366_v56 = vmul.f32 %v3082_v40, %v2357_v3  ;;  %v4110_v47 = vadd.f32 %v3083_v54, %v2365_v6 }
0x13f6   : > { %v4112_v57 = vadd.f32 %v3083_v54, %v2366_v56  ;;  %v2367_v58 = vmul.f32 %v3082_v40, %v2358_v55 }
0x13f8   : > { %v2377_v59 = vpack.c.bf16 %v4112_v57, %v4110_v47  ;;  %v4116_v60 = vadd.f32 %v3083_v54, %v2367_v58 }
0x13fa   : > { %3367 = vmatprep.mubr.msk.bf16.mxu1 %vm859_vm4, %v2377_v59  ;;  %v2378_v61 = vpack.c.bf16 %v4116_v60, %v4116_v60 }
0x13fc   : > { %3368 = vmatmul.mubr.msk.bf16.vlgmr.msra.gmra.mrb[28].mxu1 %vm859_vm4, %v2378_v61 }
0x13fd   : > { %3397 = vmatprep.mubr.msk.f32.mxu1 %vm3621_vm11, %v3612_v12 }
0x14cf   : > { %v3369_v18 = vpop.f32.mrb[28].mxu1 }
0x14d0   : > { %v2453_v19 = vadd.f32 %v3369_v18, %v3089_v17  ;;  %v2444_v24 = vpop.f32.mrb[29].mxu1 }
0x14d1   : > { %v2445_v26 = vadd.f32 %v3089_v17, %v2444_v24  ;;  %v3370_v27 = vpop.f32.mrb[30].mxu1 }
0x14d2   : > { %v2460_v28 = vmul.f32 %v2453_v19, %v2453_v19  ;;  %v2447_v29 = vpop.f32.mrb[31].mxu1  ;;  %v3620_v27 = vmov 0.0|0.0  }
0x14d3   : > { %v2458_v30 = vmul.f32 %v2445_v26, %v2445_v26  ;;  %v2448_v31 = vadd.f32 %v3089_v17, %v2447_v29  ;;  %3422 = vmatprep.subr.bf16.mxu1 %v3620_v27 }
0x14d4   : > { %v2463_v32 = vmul.f32 %v2460_v28, %v2453_v19 }
0x14d5   : > { %v2461_v33 = vmul.f32 %v2458_v30, %v2445_v26  ;;  %v2459_v23 = vmul.f32 %v2448_v31, %v2448_v31 }
0x14d6   : > { %v2466_v34 = vmul.f32 0.044715, %v2463_v32 }
0x14d7   : > { %v2464_v35 = vmul.f32 0.044715, %v2461_v33  ;;  %v2462_v36 = vmul.f32 %v2459_v23, %v2448_v31 }
0x14d8   : > { %v2469_v21 = vadd.f32 %v2466_v34, %v2453_v19 }
0x14d9   : > { %v2467_v62 = vadd.f32 %v2464_v35, %v2445_v26  ;;  %v2465_v37 = vmul.f32 0.044715, %v2462_v36  ;;  %v2673_v36 = vshrl.u32 %v747_v8, 7 }
0x14da   : > { %v2472_v38 = vmul.f32 0.7978846, %v2469_v21 }
0x14db   : > { %v2470_v15 = vmul.f32 0.7978846, %v2467_v62  ;;  %v2468_v63 = vadd.f32 %v2465_v37, %v2448_v31  ;;  %v3122_v62 = vld [vmem:[%s4234_s17 + $0x1] ss:$0 sm:$0xff]  ;;  %vm2676_vm13 = vcmp.lt.s32.totalorder %v2673_v36, 3 }
0x14dc   : > { %3591 = vtanh.f32 %v2472_v38 }
0x14dd   : > { %3593 = vtanh.f32 %v2470_v15  ;;  %v2471_v4 = vmul.f32 0.7978846, %v2468_v63 }
0x14df   : > { %3595 = vtanh.f32 %v2471_v4  ;;  %v2674_v4 = vmul.u32 8, %v2673_v36 }
0x14e1   : > { %vm2675_vm12 = vcmp.eq.s32.totalorder %v3771_v9, %v2674_v4  ;;  %v2754_v9 = vld [vmem:[%s4236_s19 + $0x10] sm:$0xff] }
0x14e2   : > { %vm2677_vm14 = vmand %vm2675_vm12, %vm2676_vm13 }
0x14e6   : > { %v3592_v39 = vpop.eup %3591 }
0x14e7   : > { %v3594_v22 = vpop.eup %3593  ;;  %v2478_v25 = vadd.f32 1.0, %v3592_v39 }
0x14e8   : > { %v2476_v41 = vadd.f32 1.0, %v3594_v22  ;;  %v3123_v22 = vld [vmem:[%s4235_s18 + $0x1] ss:$0 sm:$0xff] }
0x14e9   : > { %v3596_v20 = vpop.eup %3595  ;;  %v2481_v42 = vmul.f32 0.5, %v2478_v25 }
0x14ea   : > { %v2477_v43 = vadd.f32 1.0, %v3596_v20  ;;  %v2479_v44 = vmul.f32 0.5, %v2476_v41 }
0x14eb   : > { %v2484_v48 = vmul.f32 %v2481_v42, %v2453_v19 }
0x14ec   : > { %v2480_v45 = vmul.f32 0.5, %v2477_v43  ;;  %v2482_v16 = vmul.f32 %v2479_v44, %v2445_v26  ;;  %v2752_v44 = vld [vmem:[%s4236_s19] sm:$0xff] }
0x14ed   : > { %v2486_v50 = vpack.c.bf16 %v2484_v48, %v2484_v48 }
0x14ee   : > { %v2483_v49 = vmul.f32 %v2480_v45, %v2448_v31  ;;  %v2753_v45 = vld [vmem:[%s4236_s19 + $0x8] sm:$0xff] }
0x14f0   : > { %v2485_v2 = vpack.c.bf16 %v2483_v49, %v2482_v16  ;;  %v2678_v16 = vsel %vm2677_vm14, 1.0, %v3612_v12  ;;  %v3426_v49 = vpack.c.bf16 %v2753_v45, %v2752_v44 }
0x14f2   : > { %3387 = vmatprep.mubr.bf16.mxu0 %v2485_v2  ;;  %v2755_v2 = vld [vmem:[%s4236_s19 + $0x18] sm:$0xff] }
0x14f3   : > { %3388 = vmatmul.mubr.bf16.vlgmr.msra.gmra.mrb[32].mxu0 %v2486_v50  ;;  %v3429_v50 = vpack.c.bf16 %v2755_v2, %v2754_v9 }
0x15c6   : > { %v3389_v40 = vpop.f32.mrb[32].mxu0 }
0x15c7   : > { %v2594_v52 = vpop.f32.mrb[33].mxu0  ;;  %v2603_v46 = vadd.f32 %v3389_v40, %v3111_v51  ;;  %v2838_v40 = vld [vmem:[%s4238_s21 + $0x8] sm:$0xff] }
0x15c8   : > { %v2595_v3 = vadd.f32 %v3111_v51, %v2594_v52  ;;  %v3390_v6 = vpop.f32.mrb[34].mxu0 }
0x15c9   : > { %v2597_v53 = vpop.f32.mrb[35].mxu0  ;;  %v2610_v59 = vadd.f32 %v2603_v46, %v4116_v60  ;;  %v2839_v6 = vld [vmem:[%s4238_s21 + $0x10] sm:$0xff] }
0x15ca   : > { %v2598_v54 = vadd.f32 %v3111_v51, %v2597_v53  ;;  %v2608_v55 = vadd.f32 %v2595_v3, %v4110_v47  ;;  %v2837_v51 = vld [vmem:[%s4238_s21] sm:$0xff]  ;;  %v2840_v53 = vld [vmem:[%s4238_s21 + $0x18] sm:$0xff] }
0x15cb   : > { %v2621_v0 = vsel %vm859_vm4, %v2610_v59, 0.0  ;;  %v3432_v52 = vpack.c.bf16 %v2838_v40, %v2837_v51 }
0x15cc   : > { %v2615_v56 = vsel %vm859_vm4, %v2608_v55, 0.0  ;;  %v2609_v58 = vadd.f32 %v2598_v54, %v4112_v57  ;;  %v3435_v54 = vpack.c.bf16 %v2840_v53, %v2839_v6 }
0x15cd   : > { %2616 = vadd.xlane.f32.xlu1 %v2615_v56 }
0x15ce   : > { %v2618_v61 = vsel %vm859_vm4, %v2609_v58, 0.0 }
0x15cf   : > { %2619 = vadd.xlane.f32.xlu0 %v2618_v61 }
0x15d1   : > { %2622 = vadd.xlane.f32.xlu1 %v2621_v0 }
0x165a   : > { %v2617_v1 = vpop.xlane.xlu1 %2616 }
0x165b   : > { %v2624_v5 = vmul.f32 0.03125, %v2617_v1 }
0x165c   : > { %v2620_v7 = vpop.xlane.xlu0 %2619 }
0x165d   : > { %v2627_v10 = vsub.f32 %v2608_v55, %v2624_v5  ;;  %v2625_v11 = vmul.f32 0.03125, %v2620_v7  ;;  %v3125_v55 = vld [vmem:[%s4237_s20] ss:$0 sm:$0xff] }
0x165e   : > { %v2623_v13 = vpop.xlane.xlu1 %2622 }
0x165f   : > { %v2628_v47 = vsub.f32 %v2609_v58, %v2625_v11  ;;  %v2626_v14 = vmul.f32 0.03125, %v2623_v13  ;;  %v2630_v17 = vmul.f32 %v2627_v10, %v2627_v10 }
0x1661   : > { %v2629_v18 = vsub.f32 %v2610_v59, %v2626_v14  ;;  %v2633_v57 = vsel %vm859_vm4, %v2630_v17, 0.0  ;;  %v2631_v60 = vmul.f32 %v2628_v47, %v2628_v47 }
0x1662   : > { %2634 = vadd.xlane.f32.xlu0 %v2633_v57 }
0x1663   : > { %v2636_v19 = vsel %vm859_vm4, %v2631_v60, 0.0  ;;  %v2632_v24 = vmul.f32 %v2629_v18, %v2629_v18 }
0x1664   : > { %2637 = vadd.xlane.f32.xlu1 %v2636_v19 }
0x1665   : > { %v2639_v26 = vsel %vm859_vm4, %v2632_v24, 0.0 }
0x1666   : > { %2640 = vadd.xlane.f32.xlu0 %v2639_v26 }
0x16ef   : > { %v2635_v28 = vpop.xlane.xlu0 %2634 }
0x16f0   : > { %v2642_v29 = vmul.f32 0.03125, %v2635_v28 }
0x16f1   : > { %v2638_v30 = vpop.xlane.xlu1 %2637 }
0x16f2   : > { %v2645_v31 = vadd.f32 1e-12, %v2642_v29  ;;  %v2643_v32 = vmul.f32 0.03125, %v2638_v30 }
0x16f3   : > { %v2641_v33 = vpop.xlane.xlu0 %2640 }
0x16f4   : > { %3597 = vrsqrt.f32 %v2645_v31  ;;  %v2646_v23 = vadd.f32 1e-12, %v2643_v32  ;;  %v2644_v34 = vmul.f32 0.03125, %v2641_v33 }
0x16f6   : > { %3599 = vrsqrt.f32 %v2646_v23  ;;  %v2647_v35 = vadd.f32 1e-12, %v2644_v34 }
0x16f8   : > { %3601 = vrsqrt.f32 %v2647_v35 }
0x16fe   : > { %v3598_v21 = vpop.eup %3597 }
0x16ff   : > { %v2651_v37 = vmul.f32 %v3598_v21, %v2627_v10 }
0x1700   : > { %v3600_v38 = vpop.eup %3599 }
0x1701   : > { %v2652_v15 = vmul.f32 %v3600_v38, %v2628_v47  ;;  %v2660_v63 = vmul.f32 %v3122_v62, %v2651_v37 }
0x1702   : > { %v3602_v39 = vpop.eup %3601 }
0x1703   : > { %v2661_v25 = vmul.f32 %v3122_v62, %v2652_v15  ;;  %v2653_v41 = vmul.f32 %v3602_v39, %v2629_v18  ;;  %v2669_v20 = vadd.f32 %v3123_v22, %v2660_v63 }
0x1705   : > { %v2670_v42 = vadd.f32 %v3123_v22, %v2661_v25  ;;  %v2662_v43 = vmul.f32 %v3122_v62, %v2653_v41 }
0x1707   : > { %v3423_v8 = vpack.c.bf16 %v2670_v42, %v2669_v20  ;;  %v2671_v48 = vadd.f32 %v3123_v22, %v2662_v43 }
0x1709   : > { %3424 = vmatpush3.bf16.msra.mxu1 %v3423_v8 }
0x170a   : > { %3395 = vmatprep.subr.mxu1 %v3612_v12 }
0x170d   : > { %3396 = vmatpush3.msra.mxu1 %v2671_v48 }
0x170e   : > { %3398 = vmatmul.mubr.msk.f32.vlgmr.msra.gmra.mrb[32].mxu1 %vm1097_vm9, %v2678_v16  ;;  %3425 = vmatprep.subr.bf16.mxu1 %v3620_v27 }
0x170f   : > { %3427 = vmatpush3.bf16.msra.mxu1 %v3426_v49  ;;  %3408 = vmatprep.mubr.msk.f32.mxu1 %vm3621_vm11, %v3612_v12 }
0x1710   : > { %3428 = vmatprep.subr.bf16.mxu1 %v3620_v27 }
0x1713   : > { %3430 = vmatpush3.bf16.msra.mxu1 %v3429_v50 }
0x1714   : > { %3431 = vmatprep.subr.bf16.mxu1 %v3620_v27 }
0x17e1   : > { %v2748_v46 = vpop.f32.mrb[32].mxu1 }
0x17e2   : > { %v3399_v3 = vpop.f32.mrb[33].mxu1  ;;  %3409 = vmatmul.mubr.msk.f32.vlgmr.msra.gmra.mrb[34].mxu1 %vm859_vm4, %v2748_v46 }
0x17e3   : > { %3433 = vmatpush3.bf16.msra.mxu1 %v3432_v52  ;;  %3419 = vmatprep.mubr.msk.f32.mxu1 %vm3621_vm11, %v3612_v12  ;;  %v3127_v12 = vld [vmem:[%s4239_s22] ss:$0 sm:$0xff] }
0x17e4   : > { %3434 = vmatprep.subr.bf16.mxu1 %v3620_v27 }
0x17e7   : > { %3436 = vmatpush3.bf16.msra.mxu1 %v3435_v54 }
0x18b5   : > { %v2832_v56 = vpop.f32.mrb[34].mxu1 }
0x18b6   : > { %v2833_v58 = vadd.f32 %v3125_v55, %v2832_v56  ;;  %v3410_v59 = vpop.f32.mrb[35].mxu1 }
0x18b8   : > { %v2836_v61 = vmax.f32 %v2833_v58, 0.0 }
0x18ba   : > { %3420 = vmatmul.mubr.msk.f32.vlgmr.msra.gmra.mrb[36].mxu1 %vm859_vm4, %v2836_v61 }
0x198d   : > { %v2917_v0 = vpop.f32.mrb[36].mxu1 }
0x198e   : > { %v2918_v1 = vadd.f32 %v3127_v12, %v2917_v0  ;;  %v3421_v5 = vpop.f32.mrb[37].mxu1 }
0x1990   : > { %2921 = vst [vmem:[%s742_s6] sm:$0xff] %v2918_v1 }
0x1991 PF: > { %s33_s4 = sadd.s32 1, %s3609_s4  }
0x1992   : > { %p30_p4 = scmp.ge.s32.totalorder %s33_s4, 4  }
0x1994   :  { %32 = sbr.rel (!%p30_p4) target bundleno = 9 (0x9), region = 160 }

</bundles_post_ra>
